<compile_context>
chip_gen: v6e
topology: v6e:2x2x1
jax: 0.10.0
libtpu: 0.0.40
codegen_flags: <defaults>
</compile_context>

<pallas_src>
import functools
import math

import jax
import jax.numpy as jnp
from jax.experimental import pallas as pl
from jax.experimental.pallas import tpu as pltpu


def _multvae_kernel(src_ref, tgt_ref,
                    w1e_ref, b1e_ref,
                    w2e_ref, b2e_ref,
                    w1d_ref, b1d_ref,
                    w2d_ref, b2d_ref,
                    logits_ref, probs_ref, recon_rows_ref, kl_rows_ref,
                    *, latent_dim):
    mm = w1e_ref.dtype  # bf16 matmul operands, f32 MXU accumulation

    # F.normalize(p=2, dim=-1): rsqrt goes to the EUP slot; +1e-24 matches the
    # eps=1e-12 clamp and keeps padded all-zero rows finite.
    src = src_ref[...].astype(jnp.float32)
    sumsq = jnp.sum(src * src, axis=-1, keepdims=True)
    src = src * jax.lax.rsqrt(sumsq + 1e-24)

    # (dropout_prob == 0 -> Identity)

    # --- encoder MLP: Linear -> tanh -> Linear (fused mu/log_var matmul) ---
    h_e = jnp.tanh(
        jnp.dot(src.astype(mm), w1e_ref[...],
                preferred_element_type=jnp.float32) + b1e_ref[...])
    enc2 = (jnp.dot(h_e.astype(mm), w2e_ref[...],
                    preferred_element_type=jnp.float32) + b2e_ref[...])
    mu = enc2[:, :latent_dim]
    log_var = enc2[:, latent_dim:]

    # eval mode: sample = mu (no reparameterization noise)
    z = mu.astype(mm)

    # --- decoder MLP: Linear -> tanh -> Linear ---
    h_d = jnp.tanh(
        jnp.dot(z, w1d_ref[...], preferred_element_type=jnp.float32)
        + b1d_ref[...])
    logits = (jnp.dot(h_d.astype(mm), w2d_ref[...],
                      preferred_element_type=jnp.float32) + b2d_ref[...])
    logits_ref[...] = logits

    # softmax over the item (last) axis; probs written narrow (bf16)
    m = jnp.max(logits, axis=-1, keepdims=True)
    exp_l = jnp.exp(logits - m)
    denom = jnp.sum(exp_l, axis=-1, keepdims=True)
    probs_ref[...] = (exp_l * pl.reciprocal(denom, approx=True)
                      ).astype(probs_ref.dtype)

    # per-row multinomial loss without materializing log_softmax:
    #   -sum(log_softmax * tgt) = (m + log(denom)) * sum(tgt) - sum(logits*tgt)
    tgt = tgt_ref[...].astype(jnp.float32)
    lse = m + jnp.log(denom)
    dot_lt = jnp.sum(logits * tgt, axis=-1, keepdims=True)
    tgt_sum = jnp.sum(tgt, axis=-1, keepdims=True)
    recon_rows_ref[...] = lse * tgt_sum - dot_lt

    # per-row KL divergence
    kl_rows_ref[...] = -0.5 * jnp.sum(
        1.0 + log_var - mu * mu - jnp.exp(log_var), axis=-1, keepdims=True)


def _prepare_params(params, mm_dtype=jnp.bfloat16):
    """Cast weights to the matmul dtype, keep biases in f32."""
    return {
        "w1e": params["w1e"].astype(mm_dtype),
        "b1e": params["b1e"].astype(jnp.float32),
        "w2e": params["w2e"].astype(mm_dtype),
        "b2e": params["b2e"].astype(jnp.float32),
        "w1d": params["w1d"].astype(mm_dtype),
        "b1d": params["b1d"].astype(jnp.float32),
        "w2d": params["w2d"].astype(mm_dtype),
        "b2d": params["b2d"].astype(jnp.float32),
    }


_WEIGHT_ORDER = ("w1e", "b1e", "w2e", "b2e", "w1d", "b1d", "w2d", "b2d")


def _round_up(x, m):
    return ((x + m - 1) // m) * m


def _nbytes(shape, dtype):
    return math.prod(shape) * jnp.dtype(dtype).itemsize


def multvae_forward(source, target, params, *, latent_dim, kl_weight=1.0,
                    tile_b=256, mm_dtype=jnp.bfloat16, io_dtype=jnp.bfloat16):
    """Runs the MultVAE forward pass with a batch-tiled Pallas kernel."""
    batch, num_items = source.shape
    prepared = _prepare_params(params, mm_dtype)
    weight_args = [prepared[k] for k in _WEIGHT_ORDER]

    # Binary interaction matrices are exactly representable in bf16; halving
    # src/tgt bytes cuts input DMA ~2x in this memory-bound kernel.
    source = source.astype(io_dtype)
    target = target.astype(io_dtype)

    # ---- VMEM budget -> batch tile size -------------------------------------
    try:
        vmem_phys = int(pltpu.get_tpu_info().vmem_capacity_bytes)
    except Exception:
        vmem_phys = 64 << 20            # conservative (v7x per-core VMEM)
    budget = min(int(vmem_phys * 0.8), 112 << 20)

    weight_bytes = sum(_nbytes(w.shape, w.dtype) for w in weight_args)
    io_b = jnp.dtype(io_dtype).itemsize
    # per-batch-row bytes: double-buffered pipelined streams (src, tgt, logits
    # f32, probs bf16, recon, kl) + in-kernel f32 temporaries (src, exp(l)).
    row_bytes = 2 * ((3 * io_b + 4) * num_items + 2 * 4) + 8 * num_items

    tb = (budget - weight_bytes - (2 << 20)) // row_bytes
    tb = min(tile_b, tb, _round_up(batch, 8))
    if batch > 8:  # keep >= 2 grid steps so the parallel axis splits TCs (v7x)
        tb = min(tb, _round_up(pl.cdiv(batch, 2), 8))
    tb = max(8, (tb // 8) * 8)

    padded = _round_up(batch, tb)
    if padded != batch:
        pad = padded - batch
        source = jnp.pad(source, ((0, pad), (0, 0)))
        target = jnp.pad(target, ((0, pad), (0, 0)))
    nb = padded // tb

    row_spec = pl.BlockSpec((tb, num_items), lambda i: (i, 0))
    out_specs = (
        pl.BlockSpec((tb, num_items), lambda i: (i, 0)),   # logits (f32)
        pl.BlockSpec((tb, num_items), lambda i: (i, 0)),   # probs  (bf16)
        pl.BlockSpec((tb, 1), lambda i: (i, 0)),           # recon per row
        pl.BlockSpec((tb, 1), lambda i: (i, 0)),           # kl per row
    )
    out_shape = (
        jax.ShapeDtypeStruct((padded, num_items), jnp.float32),
        jax.ShapeDtypeStruct((padded, num_items), io_dtype),
        jax.ShapeDtypeStruct((padded, 1), jnp.float32),
        jax.ShapeDtypeStruct((padded, 1), jnp.float32),
    )
    kernel = functools.partial(_multvae_kernel, latent_dim=latent_dim)

    # TODO(synk): for production item counts (num_items >~ 10k) add a reduction
    # axis over items (tile w1e over K, w2d/logits over N) instead of relying
    # on fully-resident weights.
    def _run(buffer_weights_once):
        if buffer_weights_once:
            w_specs = [pl.BlockSpec(w.shape, lambda i: (0, 0),
                                    pipeline_mode=pl.Buffered(1))
                       for w in weight_args]
        else:
            w_specs = [pl.BlockSpec(w.shape, lambda i: (0, 0))
                       for w in weight_args]
        return pl.pallas_call(
            kernel,
            grid=(nb,),
            in_specs=[row_spec, row_spec] + w_specs,
            out_specs=out_specs,
            out_shape=out_shape,
            compiler_params=pltpu.CompilerParams(
                dimension_semantics=("parallel",),
                vmem_limit_bytes=int(budget)),
        )(source, target, *weight_args)

    try:
        logits, probs, recon_rows, kl_rows = _run(True)
    except Exception:
        # Fallback if this jax version rejects pipeline_mode=pl.Buffered(1).
        logits, probs, recon_rows, kl_rows = _run(False)

    # Finish the batch means outside the kernel (correct for any tiling and the
    # dual-core grid split); padded rows are dropped here.
    recon_loss = jnp.mean(recon_rows[:batch, 0])
    kl_loss = jnp.mean(kl_rows[:batch, 0])
    return {
        "logits": logits[:batch],
        "probs": probs[:batch],
        "recon_loss": recon_loss,
        "kl_loss": kl_loss,
        "loss": recon_loss + jnp.float32(kl_weight) * kl_loss,
    }


def _reference_forward(source, target, prepared, *, latent_dim, kl_weight=1.0):
    """Pure-JAX reference mirroring the PyTorch module (eval mode) with the
    kernel's mixed-precision policy (bf16 matmul operands, f32 accumulation)."""
    mm = prepared["w1e"].dtype
    src = source.astype(jnp.float32)
    src = src * jax.lax.rsqrt(jnp.sum(src * src, axis=-1, keepdims=True) + 1e-24)
    h_e = jnp.tanh(jnp.dot(src.astype(mm), prepared["w1e"],
                           preferred_element_type=jnp.float32) + prepared["b1e"])
    enc2 = (jnp.dot(h_e.astype(mm), prepared["w2e"],
                    preferred_element_type=jnp.float32) + prepared["b2e"])
    mu = enc2[:, :latent_dim]
    log_var = enc2[:, latent_dim:]
    h_d = jnp.tanh(jnp.dot(mu.astype(mm), prepared["w1d"],
                           preferred_element_type=jnp.float32) + prepared["b1d"])
    logits = (jnp.dot(h_d.astype(mm), prepared["w2d"],
                      preferred_element_type=jnp.float32) + prepared["b2d"])
    log_sm = jax.nn.log_softmax(logits, axis=-1)
    recon = -jnp.mean(jnp.sum(log_sm * target, axis=-1))
    kl = jnp.mean(
        -0.5 * jnp.sum(1.0 + log_var - mu * mu - jnp.exp(log_var), axis=-1))
    return {
        "logits": logits,
        "probs": jax.nn.softmax(logits, axis=-1),
        "recon_loss": recon,
        "kl_loss": kl,
        "loss": recon + kl_weight * kl,
    }


if __name__ == "__main__":
    # Small MultVAE configuration.
    batch = 8
    num_items = 256     # encoder input / decoder output dimension
    hidden = 128        # MLP hidden width
    latent_dim = 64     # encoder.output_size() == 2 * latent_dim == 128

    key = jax.random.PRNGKey(0)
    keys = jax.random.split(key, 10)

    def init_w(k, fan_in, fan_out):
        bound = 1.0 / jnp.sqrt(fan_in)
        return jax.random.uniform(
            k, (fan_in, fan_out), jnp.float32, -bound, bound)

    params = {
        # encoder: num_items -> hidden -> 2*latent_dim
        "w1e": init_w(keys[0], num_items, hidden),
        "b1e": jax.random.uniform(keys[1], (1, hidden), jnp.float32, -0.05, 0.05),
        "w2e": init_w(keys[2], hidden, 2 * latent_dim),
        "b2e": jax.random.uniform(keys[3], (1, 2 * latent_dim), jnp.float32, -0.05, 0.05),
        # decoder: latent_dim -> hidden -> num_items
        "w1d": init_w(keys[4], latent_dim, hidden),
        "b1d": jax.random.uniform(keys[5], (1, hidden), jnp.float32, -0.05, 0.05),
        "w2d": init_w(keys[6], hidden, num_items),
        "b2d": jax.random.uniform(keys[7], (1, num_items), jnp.float32, -0.05, 0.05),
    }

    # Implicit-feedback style inputs: binary interaction matrices.
    source = jax.random.bernoulli(keys[8], 0.15, (batch, num_items)).astype(jnp.float32)
    target = jax.random.bernoulli(keys[9], 0.15, (batch, num_items)).astype(jnp.float32)

    out = multvae_forward(source, target, params, latent_dim=latent_dim)
    out = jax.tree_util.tree_map(jax.block_until_ready, out)

    prepared = _prepare_params(params)
    ref = _reference_forward(source, target, prepared, latent_dim=latent_dim)

    assert jnp.allclose(out["logits"], ref["logits"], atol=2e-3, rtol=2e-3)
    assert jnp.allclose(out["probs"].astype(jnp.float32), ref["probs"],
                        atol=2e-3, rtol=1e-2)
    assert jnp.allclose(out["recon_loss"], ref["recon_loss"], atol=1e-2, rtol=1e-3)
    assert jnp.allclose(out["kl_loss"], ref["kl_loss"], atol=1e-3, rtol=1e-3)
    assert jnp.allclose(out["loss"], ref["loss"], atol=1e-2, rtol=1e-3)

    # TODO(synk): training-mode reparameterization noise (torch.randn_like),
    # dropout, and kl_scheduler.step() are omitted; eval-mode semantics
    # (sample = mu, Identity dropout, Constant kl weight) are implemented exactly.
    print("KERNEL_OK")
</pallas_src>

<mosaic_0001>
module attributes {stable_mosaic.version = 11 : i64} {
  func.func @_multvae_kernel(%arg0: i32, %arg1: memref<8x256xbf16, #tpu.memory_space<vmem>>, %arg2: memref<8x256xbf16, #tpu.memory_space<vmem>>, %arg3: memref<256x128xbf16, #tpu.memory_space<vmem>>, %arg4: memref<1x128xf32, #tpu.memory_space<vmem>>, %arg5: memref<128x128xbf16, #tpu.memory_space<vmem>>, %arg6: memref<1x128xf32, #tpu.memory_space<vmem>>, %arg7: memref<64x128xbf16, #tpu.memory_space<vmem>>, %arg8: memref<1x128xf32, #tpu.memory_space<vmem>>, %arg9: memref<128x256xbf16, #tpu.memory_space<vmem>>, %arg10: memref<1x256xf32, #tpu.memory_space<vmem>>, %arg11: memref<8x256xf32, #tpu.memory_space<vmem>>, %arg12: memref<8x256xbf16, #tpu.memory_space<vmem>>, %arg13: memref<8x1xf32, #tpu.memory_space<vmem>>, %arg14: memref<8x1xf32, #tpu.memory_space<vmem>>) attributes {dimension_semantics = [#tpu.dimension_semantics<parallel>], iteration_bounds = array<i64: 1>, scalar_prefetch = 0 : i64, scratch_operands = 0 : i64, tpu.core_type = #tpu.core_type<tc>, window_params = [{transform_indices = @transform_0, window_bounds = array<i64: 8, 256>}, {transform_indices = @transform_1, window_bounds = array<i64: 8, 256>}, {pipeline_mode = #tpu.pipeline_mode<synchronous>, transform_indices = @transform_2, window_bounds = array<i64: 256, 128>}, {pipeline_mode = #tpu.pipeline_mode<synchronous>, transform_indices = @transform_3, window_bounds = array<i64: 1, 128>}, {pipeline_mode = #tpu.pipeline_mode<synchronous>, transform_indices = @transform_4, window_bounds = array<i64: 128, 128>}, {pipeline_mode = #tpu.pipeline_mode<synchronous>, transform_indices = @transform_5, window_bounds = array<i64: 1, 128>}, {pipeline_mode = #tpu.pipeline_mode<synchronous>, transform_indices = @transform_6, window_bounds = array<i64: 64, 128>}, {pipeline_mode = #tpu.pipeline_mode<synchronous>, transform_indices = @transform_7, window_bounds = array<i64: 1, 128>}, {pipeline_mode = #tpu.pipeline_mode<synchronous>, transform_indices = @transform_8, window_bounds = array<i64: 128, 256>}, {pipeline_mode = #tpu.pipeline_mode<synchronous>, transform_indices = @transform_9, window_bounds = array<i64: 1, 256>}, {transform_indices = @transform_10, window_bounds = array<i64: 8, 256>}, {transform_indices = @transform_11, window_bounds = array<i64: 8, 256>}, {transform_indices = @transform_12, window_bounds = array<i64: 8, 1>}, {transform_indices = @transform_13, window_bounds = array<i64: 8, 1>}]} {
    %c0 = arith.constant 0 : index
    %c0_0 = arith.constant 0 : index
    %0 = vector.load %arg1[%c0, %c0_0] : memref<8x256xbf16, #tpu.memory_space<vmem>>, vector<8x256xbf16>
    %1 = arith.extf %0 : vector<8x256xbf16> to vector<8x256xf32>
    %2 = arith.mulf %1, %1 : vector<8x256xf32>
    %cst = arith.constant dense<0.000000e+00> : vector<8xf32>
    %3 = vector.multi_reduction <add>, %2, %cst [1] : vector<8x256xf32> to vector<8xf32>
    %4 = vector.shape_cast %3 : vector<8xf32> to vector<8x1xf32>
    %cst_1 = arith.constant 1.000000e-24 : f32
    %5 = vector.broadcast %cst_1 : f32 to vector<8x1xf32>
    %6 = arith.addf %4, %5 : vector<8x1xf32>
    %7 = math.rsqrt %6 : vector<8x1xf32>
    %8 = vector.broadcast %7 : vector<8x1xf32> to vector<8x256xf32>
    %9 = arith.mulf %1, %8 : vector<8x256xf32>
    %10 = arith.truncf %9 : vector<8x256xf32> to vector<8x256xbf16>
    %c0_2 = arith.constant 0 : index
    %c0_3 = arith.constant 0 : index
    %11 = vector.load %arg3[%c0_2, %c0_3] : memref<256x128xbf16, #tpu.memory_space<vmem>>, vector<256x128xbf16>
    %cst_4 = arith.constant dense<0.000000e+00> : vector<8x128xf32>
    %12 = tpu.matmul %10, %11, %cst_4 {dimension_numbers = #tpu.dot_dimension_numbers<[1], [0], [0], [1], [0, 0, 1, 1], [], []>} : vector<8x256xbf16>, vector<256x128xbf16>, vector<8x128xf32> -> vector<8x128xf32>
    %c0_5 = arith.constant 0 : index
    %c0_6 = arith.constant 0 : index
    %13 = vector.load %arg4[%c0_5, %c0_6] : memref<1x128xf32, #tpu.memory_space<vmem>>, vector<1x128xf32>
    %14 = vector.broadcast %13 : vector<1x128xf32> to vector<8x128xf32>
    %15 = arith.addf %12, %14 : vector<8x128xf32>
    %16 = math.tanh %15 : vector<8x128xf32>
    %17 = arith.truncf %16 : vector<8x128xf32> to vector<8x128xbf16>
    %c0_7 = arith.constant 0 : index
    %c0_8 = arith.constant 0 : index
    %18 = vector.load %arg5[%c0_7, %c0_8] : memref<128x128xbf16, #tpu.memory_space<vmem>>, vector<128x128xbf16>
    %cst_9 = arith.constant dense<0.000000e+00> : vector<8x128xf32>
    %19 = tpu.matmul %17, %18, %cst_9 {dimension_numbers = #tpu.dot_dimension_numbers<[1], [0], [0], [1], [0, 0, 1, 1], [], []>} : vector<8x128xbf16>, vector<128x128xbf16>, vector<8x128xf32> -> vector<8x128xf32>
    %c0_10 = arith.constant 0 : index
    %c0_11 = arith.constant 0 : index
    %20 = vector.load %arg6[%c0_10, %c0_11] : memref<1x128xf32, #tpu.memory_space<vmem>>, vector<1x128xf32>
    %21 = vector.broadcast %20 : vector<1x128xf32> to vector<8x128xf32>
    %22 = arith.addf %19, %21 : vector<8x128xf32>
    %23 = vector.extract_strided_slice %22 {offsets = [0, 0], sizes = [8, 64], strides = [1, 1]} : vector<8x128xf32> to vector<8x64xf32>
    %24 = vector.extract_strided_slice %22 {offsets = [0, 64], sizes = [8, 64], strides = [1, 1]} : vector<8x128xf32> to vector<8x64xf32>
    %25 = arith.truncf %23 : vector<8x64xf32> to vector<8x64xbf16>
    %c0_12 = arith.constant 0 : index
    %c0_13 = arith.constant 0 : index
    %26 = vector.load %arg7[%c0_12, %c0_13] : memref<64x128xbf16, #tpu.memory_space<vmem>>, vector<64x128xbf16>
    %cst_14 = arith.constant dense<0.000000e+00> : vector<8x128xf32>
    %27 = tpu.matmul %25, %26, %cst_14 {dimension_numbers = #tpu.dot_dimension_numbers<[1], [0], [0], [1], [0, 0, 1, 1], [], []>} : vector<8x64xbf16>, vector<64x128xbf16>, vector<8x128xf32> -> vector<8x128xf32>
    %c0_15 = arith.constant 0 : index
    %c0_16 = arith.constant 0 : index
    %28 = vector.load %arg8[%c0_15, %c0_16] : memref<1x128xf32, #tpu.memory_space<vmem>>, vector<1x128xf32>
    %29 = vector.broadcast %28 : vector<1x128xf32> to vector<8x128xf32>
    %30 = arith.addf %27, %29 : vector<8x128xf32>
    %31 = math.tanh %30 : vector<8x128xf32>
    %32 = arith.truncf %31 : vector<8x128xf32> to vector<8x128xbf16>
    %c0_17 = arith.constant 0 : index
    %c0_18 = arith.constant 0 : index
    %33 = vector.load %arg9[%c0_17, %c0_18] : memref<128x256xbf16, #tpu.memory_space<vmem>>, vector<128x256xbf16>
    %cst_19 = arith.constant dense<0.000000e+00> : vector<8x256xf32>
    %34 = tpu.matmul %32, %33, %cst_19 {dimension_numbers = #tpu.dot_dimension_numbers<[1], [0], [0], [1], [0, 0, 1, 1], [], []>} : vector<8x128xbf16>, vector<128x256xbf16>, vector<8x256xf32> -> vector<8x256xf32>
    %c0_20 = arith.constant 0 : index
    %c0_21 = arith.constant 0 : index
    %35 = vector.load %arg10[%c0_20, %c0_21] : memref<1x256xf32, #tpu.memory_space<vmem>>, vector<1x256xf32>
    %36 = vector.broadcast %35 : vector<1x256xf32> to vector<8x256xf32>
    %37 = arith.addf %34, %36 : vector<8x256xf32>
    %c0_22 = arith.constant 0 : index
    %c0_23 = arith.constant 0 : index
    %38 = vector.load %arg11[%c0_22, %c0_23] : memref<8x256xf32, #tpu.memory_space<vmem>>, vector<8x256xf32>
    tpu.vector_store %arg11[%c0_22, %c0_23], %37 {strides = array<i32>} : memref<8x256xf32, #tpu.memory_space<vmem>>, vector<8x256xf32>,
    %cst_24 = arith.constant dense<0xFF800000> : vector<8xf32>
    %39 = vector.multi_reduction <maximumf>, %37, %cst_24 [1] : vector<8x256xf32> to vector<8xf32>
    %40 = vector.shape_cast %39 : vector<8xf32> to vector<8x1xf32>
    %41 = vector.broadcast %40 : vector<8x1xf32> to vector<8x256xf32>
    %42 = arith.subf %37, %41 : vector<8x256xf32>
    %43 = math.exp %42 : vector<8x256xf32>
    %cst_25 = arith.constant dense<0.000000e+00> : vector<8xf32>
    %44 = vector.multi_reduction <add>, %43, %cst_25 [1] : vector<8x256xf32> to vector<8xf32>
    %45 = vector.shape_cast %44 : vector<8xf32> to vector<8x1xf32>
    %46 = tpu.reciprocal %45 {approx = true} : vector<8x1xf32> -> vector<8x1xf32>
    %47 = vector.broadcast %46 : vector<8x1xf32> to vector<8x256xf32>
    %48 = arith.mulf %43, %47 : vector<8x256xf32>
    %49 = arith.truncf %48 : vector<8x256xf32> to vector<8x256xbf16>
    %c0_26 = arith.constant 0 : index
    %c0_27 = arith.constant 0 : index
    %50 = vector.load %arg12[%c0_26, %c0_27] : memref<8x256xbf16, #tpu.memory_space<vmem>>, vector<8x256xbf16>
    tpu.vector_store %arg12[%c0_26, %c0_27], %49 {strides = array<i32>} : memref<8x256xbf16, #tpu.memory_space<vmem>>, vector<8x256xbf16>,
    %c0_28 = arith.constant 0 : index
    %c0_29 = arith.constant 0 : index
    %51 = vector.load %arg2[%c0_28, %c0_29] : memref<8x256xbf16, #tpu.memory_space<vmem>>, vector<8x256xbf16>
    %52 = arith.extf %51 : vector<8x256xbf16> to vector<8x256xf32>
    %53 = math.log %45 : vector<8x1xf32>
    %54 = arith.addf %40, %53 : vector<8x1xf32>
    %55 = arith.mulf %37, %52 : vector<8x256xf32>
    %cst_30 = arith.constant dense<0.000000e+00> : vector<8xf32>
    %56 = vector.multi_reduction <add>, %55, %cst_30 [1] : vector<8x256xf32> to vector<8xf32>
    %57 = vector.shape_cast %56 : vector<8xf32> to vector<8x1xf32>
    %cst_31 = arith.constant dense<0.000000e+00> : vector<8xf32>
    %58 = vector.multi_reduction <add>, %52, %cst_31 [1] : vector<8x256xf32> to vector<8xf32>
    %59 = vector.shape_cast %58 : vector<8xf32> to vector<8x1xf32>
    %60 = arith.mulf %54, %59 : vector<8x1xf32>
    %61 = arith.subf %60, %57 : vector<8x1xf32>
    %c0_32 = arith.constant 0 : index
    %c0_33 = arith.constant 0 : index
    %62 = vector.load %arg13[%c0_32, %c0_33] : memref<8x1xf32, #tpu.memory_space<vmem>>, vector<8x1xf32>
    tpu.vector_store %arg13[%c0_32, %c0_33], %61 {strides = array<i32>} : memref<8x1xf32, #tpu.memory_space<vmem>>, vector<8x1xf32>,
    %cst_34 = arith.constant 1.000000e+00 : f32
    %63 = vector.broadcast %cst_34 : f32 to vector<8x64xf32>
    %64 = arith.addf %63, %24 : vector<8x64xf32>
    %65 = arith.mulf %23, %23 : vector<8x64xf32>
    %66 = arith.subf %64, %65 : vector<8x64xf32>
    %67 = math.exp %24 : vector<8x64xf32>
    %68 = arith.subf %66, %67 : vector<8x64xf32>
    %cst_35 = arith.constant dense<0.000000e+00> : vector<8xf32>
    %69 = vector.multi_reduction <add>, %68, %cst_35 [1] : vector<8x64xf32> to vector<8xf32>
    %70 = vector.shape_cast %69 : vector<8xf32> to vector<8x1xf32>
    %cst_36 = arith.constant -5.000000e-01 : f32
    %71 = vector.broadcast %cst_36 : f32 to vector<8x1xf32>
    %72 = arith.mulf %71, %70 : vector<8x1xf32>
    %c0_37 = arith.constant 0 : index
    %c0_38 = arith.constant 0 : index
    %73 = vector.load %arg14[%c0_37, %c0_38] : memref<8x1xf32, #tpu.memory_space<vmem>>, vector<8x1xf32>
    tpu.vector_store %arg14[%c0_37, %c0_38], %72 {strides = array<i32>} : memref<8x1xf32, #tpu.memory_space<vmem>>, vector<8x1xf32>,
    return
  }
  func.func @transform_0(%arg0: i32) -> (i32, i32) {
    %c0_i32 = arith.constant 0 : i32
    %c0_i32_0 = arith.constant 0 : i32
    return %arg0, %c0_i32 : i32, i32
  }
  func.func @transform_1(%arg0: i32) -> (i32, i32) {
    %c0_i32 = arith.constant 0 : i32
    %c0_i32_0 = arith.constant 0 : i32
    return %arg0, %c0_i32 : i32, i32
  }
  func.func @transform_2(%arg0: i32) -> (i32, i32) {
    %c0_i32 = arith.constant 0 : i32
    %c0_i32_0 = arith.constant 0 : i32
    %c0_i32_1 = arith.constant 0 : i32
    return %c0_i32, %c0_i32_0 : i32, i32
  }
  func.func @transform_3(%arg0: i32) -> (i32, i32) {
    %c0_i32 = arith.constant 0 : i32
    %c0_i32_0 = arith.constant 0 : i32
    %c0_i32_1 = arith.constant 0 : i32
    return %c0_i32, %c0_i32_0 : i32, i32
  }
  func.func @transform_4(%arg0: i32) -> (i32, i32) {
    %c0_i32 = arith.constant 0 : i32
    %c0_i32_0 = arith.constant 0 : i32
    %c0_i32_1 = arith.constant 0 : i32
    return %c0_i32, %c0_i32_0 : i32, i32
  }
  func.func @transform_5(%arg0: i32) -> (i32, i32) {
    %c0_i32 = arith.constant 0 : i32
    %c0_i32_0 = arith.constant 0 : i32
    %c0_i32_1 = arith.constant 0 : i32
    return %c0_i32, %c0_i32_0 : i32, i32
  }
  func.func @transform_6(%arg0: i32) -> (i32, i32) {
    %c0_i32 = arith.constant 0 : i32
    %c0_i32_0 = arith.constant 0 : i32
    %c0_i32_1 = arith.constant 0 : i32
    return %c0_i32, %c0_i32_0 : i32, i32
  }
  func.func @transform_7(%arg0: i32) -> (i32, i32) {
    %c0_i32 = arith.constant 0 : i32
    %c0_i32_0 = arith.constant 0 : i32
    %c0_i32_1 = arith.constant 0 : i32
    return %c0_i32, %c0_i32_0 : i32, i32
  }
  func.func @transform_8(%arg0: i32) -> (i32, i32) {
    %c0_i32 = arith.constant 0 : i32
    %c0_i32_0 = arith.constant 0 : i32
    %c0_i32_1 = arith.constant 0 : i32
    return %c0_i32, %c0_i32_0 : i32, i32
  }
  func.func @transform_9(%arg0: i32) -> (i32, i32) {
    %c0_i32 = arith.constant 0 : i32
    %c0_i32_0 = arith.constant 0 : i32
    %c0_i32_1 = arith.constant 0 : i32
    return %c0_i32, %c0_i32_0 : i32, i32
  }
  func.func @transform_10(%arg0: i32) -> (i32, i32) {
    %c0_i32 = arith.constant 0 : i32
    %c0_i32_0 = arith.constant 0 : i32
    return %arg0, %c0_i32 : i32, i32
  }
  func.func @transform_11(%arg0: i32) -> (i32, i32) {
    %c0_i32 = arith.constant 0 : i32
    %c0_i32_0 = arith.constant 0 : i32
    return %arg0, %c0_i32 : i32, i32
  }
  func.func @transform_12(%arg0: i32) -> (i32, i32) {
    %c0_i32 = arith.constant 0 : i32
    %c0_i32_0 = arith.constant 0 : i32
    return %arg0, %c0_i32 : i32, i32
  }
  func.func @transform_13(%arg0: i32) -> (i32, i32) {
    %c0_i32 = arith.constant 0 : i32
    %c0_i32_0 = arith.constant 0 : i32
    return %arg0, %c0_i32 : i32, i32
  }
}

module attributes {stable_mosaic.version = 11 : i64} {
  func.func @_multvae_kernel(%arg0: i32, %arg1: memref<8x256xbf16, #tpu.memory_space<vmem>>, %arg2: memref<8x256xbf16, #tpu.memory_space<vmem>>, %arg3: memref<256x128xbf16, #tpu.memory_space<vmem>>, %arg4: memref<1x128xf32, #tpu.memory_space<vmem>>, %arg5: memref<128x128xbf16, #tpu.memory_space<vmem>>, %arg6: memref<1x128xf32, #tpu.memory_space<vmem>>, %arg7: memref<64x128xbf16, #tpu.memory_space<vmem>>, %arg8: memref<1x128xf32, #tpu.memory_space<vmem>>, %arg9: memref<128x256xbf16, #tpu.memory_space<vmem>>, %arg10: memref<1x256xf32, #tpu.memory_space<vmem>>, %arg11: memref<8x256xf32, #tpu.memory_space<vmem>>, %arg12: memref<8x256xbf16, #tpu.memory_space<vmem>>, %arg13: memref<8x1xf32, #tpu.memory_space<vmem>>, %arg14: memref<8x1xf32, #tpu.memory_space<vmem>>) attributes {dimension_semantics = [#tpu.dimension_semantics<parallel>], iteration_bounds = array<i64: 1>, scalar_prefetch = 0 : i64, scratch_operands = 0 : i64, tpu.core_type = #tpu.core_type<tc>, window_params = [{transform_indices = @transform_0, window_bounds = array<i64: 8, 256>}, {transform_indices = @transform_1, window_bounds = array<i64: 8, 256>}, {pipeline_mode = #tpu.pipeline_mode<synchronous>, transform_indices = @transform_2, window_bounds = array<i64: 256, 128>}, {pipeline_mode = #tpu.pipeline_mode<synchronous>, transform_indices = @transform_3, window_bounds = array<i64: 1, 128>}, {pipeline_mode = #tpu.pipeline_mode<synchronous>, transform_indices = @transform_4, window_bounds = array<i64: 128, 128>}, {pipeline_mode = #tpu.pipeline_mode<synchronous>, transform_indices = @transform_5, window_bounds = array<i64: 1, 128>}, {pipeline_mode = #tpu.pipeline_mode<synchronous>, transform_indices = @transform_6, window_bounds = array<i64: 64, 128>}, {pipeline_mode = #tpu.pipeline_mode<synchronous>, transform_indices = @transform_7, window_bounds = array<i64: 1, 128>}, {pipeline_mode = #tpu.pipeline_mode<synchronous>, transform_indices = @transform_8, window_bounds = array<i64: 128, 256>}, {pipeline_mode = #tpu.pipeline_mode<synchronous>, transform_indices = @transform_9, window_bounds = array<i64: 1, 256>}, {transform_indices = @transform_10, window_bounds = array<i64: 8, 256>}, {transform_indices = @transform_11, window_bounds = array<i64: 8, 256>}, {transform_indices = @transform_12, window_bounds = array<i64: 8, 1>}, {transform_indices = @transform_13, window_bounds = array<i64: 8, 1>}]} {
    %c0 = arith.constant 0 : index
    %c0_0 = arith.constant 0 : index
    %0 = vector.load %arg1[%c0, %c0_0] : memref<8x256xbf16, #tpu.memory_space<vmem>>, vector<8x256xbf16>
    %1 = arith.extf %0 : vector<8x256xbf16> to vector<8x256xf32>
    %2 = arith.mulf %1, %1 : vector<8x256xf32>
    %cst = arith.constant dense<0.000000e+00> : vector<8xf32>
    %3 = vector.multi_reduction <add>, %2, %cst [1] : vector<8x256xf32> to vector<8xf32>
    %4 = vector.shape_cast %3 : vector<8xf32> to vector<8x1xf32>
    %cst_1 = arith.constant 1.000000e-24 : f32
    %5 = vector.broadcast %cst_1 : f32 to vector<8x1xf32>
    %6 = arith.addf %4, %5 : vector<8x1xf32>
    %7 = math.rsqrt %6 : vector<8x1xf32>
    %8 = vector.broadcast %7 : vector<8x1xf32> to vector<8x256xf32>
    %9 = arith.mulf %1, %8 : vector<8x256xf32>
    %10 = arith.truncf %9 : vector<8x256xf32> to vector<8x256xbf16>
    %c0_2 = arith.constant 0 : index
    %c0_3 = arith.constant 0 : index
    %11 = vector.load %arg3[%c0_2, %c0_3] : memref<256x128xbf16, #tpu.memory_space<vmem>>, vector<256x128xbf16>
    %cst_4 = arith.constant dense<0.000000e+00> : vector<8x128xf32>
    %12 = tpu.matmul %10, %11, %cst_4 {dimension_numbers = #tpu.dot_dimension_numbers<[1], [0], [0], [1], [0, 0, 1, 1], [], []>} : vector<8x256xbf16>, vector<256x128xbf16>, vector<8x128xf32> -> vector<8x128xf32>
    %c0_5 = arith.constant 0 : index
    %c0_6 = arith.constant 0 : index
    %13 = vector.load %arg4[%c0_5, %c0_6] : memref<1x128xf32, #tpu.memory_space<vmem>>, vector<1x128xf32>
    %14 = vector.broadcast %13 : vector<1x128xf32> to vector<8x128xf32>
    %15 = arith.addf %12, %14 : vector<8x128xf32>
    %16 = math.tanh %15 : vector<8x128xf32>
    %17 = arith.truncf %16 : vector<8x128xf32> to vector<8x128xbf16>
    %c0_7 = arith.constant 0 : index
    %c0_8 = arith.constant 0 : index
    %18 = vector.load %arg5[%c0_7, %c0_8] : memref<128x128xbf16, #tpu.memory_space<vmem>>, vector<128x128xbf16>
    %cst_9 = arith.constant dense<0.000000e+00> : vector<8x128xf32>
    %19 = tpu.matmul %17, %18, %cst_9 {dimension_numbers = #tpu.dot_dimension_numbers<[1], [0], [0], [1], [0, 0, 1, 1], [], []>} : vector<8x128xbf16>, vector<128x128xbf16>, vector<8x128xf32> -> vector<8x128xf32>
    %c0_10 = arith.constant 0 : index
    %c0_11 = arith.constant 0 : index
    %20 = vector.load %arg6[%c0_10, %c0_11] : memref<1x128xf32, #tpu.memory_space<vmem>>, vector<1x128xf32>
    %21 = vector.broadcast %20 : vector<1x128xf32> to vector<8x128xf32>
    %22 = arith.addf %19, %21 : vector<8x128xf32>
    %23 = vector.extract_strided_slice %22 {offsets = [0, 0], sizes = [8, 64], strides = [1, 1]} : vector<8x128xf32> to vector<8x64xf32>
    %24 = vector.extract_strided_slice %22 {offsets = [0, 64], sizes = [8, 64], strides = [1, 1]} : vector<8x128xf32> to vector<8x64xf32>
    %25 = arith.truncf %23 : vector<8x64xf32> to vector<8x64xbf16>
    %c0_12 = arith.constant 0 : index
    %c0_13 = arith.constant 0 : index
    %26 = vector.load %arg7[%c0_12, %c0_13] : memref<64x128xbf16, #tpu.memory_space<vmem>>, vector<64x128xbf16>
    %cst_14 = arith.constant dense<0.000000e+00> : vector<8x128xf32>
    %27 = tpu.matmul %25, %26, %cst_14 {dimension_numbers = #tpu.dot_dimension_numbers<[1], [0], [0], [1], [0, 0, 1, 1], [], []>} : vector<8x64xbf16>, vector<64x128xbf16>, vector<8x128xf32> -> vector<8x128xf32>
    %c0_15 = arith.constant 0 : index
    %c0_16 = arith.constant 0 : index
    %28 = vector.load %arg8[%c0_15, %c0_16] : memref<1x128xf32, #tpu.memory_space<vmem>>, vector<1x128xf32>
    %29 = vector.broadcast %28 : vector<1x128xf32> to vector<8x128xf32>
    %30 = arith.addf %27, %29 : vector<8x128xf32>
    %31 = math.tanh %30 : vector<8x128xf32>
    %32 = arith.truncf %31 : vector<8x128xf32> to vector<8x128xbf16>
    %c0_17 = arith.constant 0 : index
    %c0_18 = arith.constant 0 : index
    %33 = vector.load %arg9[%c0_17, %c0_18] : memref<128x256xbf16, #tpu.memory_space<vmem>>, vector<128x256xbf16>
    %cst_19 = arith.constant dense<0.000000e+00> : vector<8x256xf32>
    %34 = tpu.matmul %32, %33, %cst_19 {dimension_numbers = #tpu.dot_dimension_numbers<[1], [0], [0], [1], [0, 0, 1, 1], [], []>} : vector<8x128xbf16>, vector<128x256xbf16>, vector<8x256xf32> -> vector<8x256xf32>
    %c0_20 = arith.constant 0 : index
    %c0_21 = arith.constant 0 : index
    %35 = vector.load %arg10[%c0_20, %c0_21] : memref<1x256xf32, #tpu.memory_space<vmem>>, vector<1x256xf32>
    %36 = vector.broadcast %35 : vector<1x256xf32> to vector<8x256xf32>
    %37 = arith.addf %34, %36 : vector<8x256xf32>
    %c0_22 = arith.constant 0 : index
    %c0_23 = arith.constant 0 : index
    %38 = vector.load %arg11[%c0_22, %c0_23] : memref<8x256xf32, #tpu.memory_space<vmem>>, vector<8x256xf32>
    tpu.vector_store %arg11[%c0_22, %c0_23], %37 {strides = array<i32>} : memref<8x256xf32, #tpu.memory_space<vmem>>, vector<8x256xf32>,
    %cst_24 = arith.constant dense<0xFF800000> : vector<8xf32>
    %39 = vector.multi_reduction <maximumf>, %37, %cst_24 [1] : vector<8x256xf32> to vector<8xf32>
    %40 = vector.shape_cast %39 : vector<8xf32> to vector<8x1xf32>
    %41 = vector.broadcast %40 : vector<8x1xf32> to vector<8x256xf32>
    %42 = arith.subf %37, %41 : vector<8x256xf32>
    %43 = math.exp %42 : vector<8x256xf32>
    %cst_25 = arith.constant dense<0.000000e+00> : vector<8xf32>
    %44 = vector.multi_reduction <add>, %43, %cst_25 [1] : vector<8x256xf32> to vector<8xf32>
    %45 = vector.shape_cast %44 : vector<8xf32> to vector<8x1xf32>
    %46 = tpu.reciprocal %45 {approx = true} : vector<8x1xf32> -> vector<8x1xf32>
    %47 = vector.broadcast %46 : vector<8x1xf32> to vector<8x256xf32>
    %48 = arith.mulf %43, %47 : vector<8x256xf32>
    %49 = arith.truncf %48 : vector<8x256xf32> to vector<8x256xbf16>
    %c0_26 = arith.constant 0 : index
    %c0_27 = arith.constant 0 : index
    %50 = vector.load %arg12[%c0_26, %c0_27] : memref<8x256xbf16, #tpu.memory_space<vmem>>, vector<8x256xbf16>
    tpu.vector_store %arg12[%c0_26, %c0_27], %49 {strides = array<i32>} : memref<8x256xbf16, #tpu.memory_space<vmem>>, vector<8x256xbf16>,
    %c0_28 = arith.constant 0 : index
    %c0_29 = arith.constant 0 : index
    %51 = vector.load %arg2[%c0_28, %c0_29] : memref<8x256xbf16, #tpu.memory_space<vmem>>, vector<8x256xbf16>
    %52 = arith.extf %51 : vector<8x256xbf16> to vector<8x256xf32>
    %53 = math.log %45 : vector<8x1xf32>
    %54 = arith.addf %40, %53 : vector<8x1xf32>
    %55 = arith.mulf %37, %52 : vector<8x256xf32>
    %cst_30 = arith.constant dense<0.000000e+00> : vector<8xf32>
    %56 = vector.multi_reduction <add>, %55, %cst_30 [1] : vector<8x256xf32> to vector<8xf32>
    %57 = vector.shape_cast %56 : vector<8xf32> to vector<8x1xf32>
    %cst_31 = arith.constant dense<0.000000e+00> : vector<8xf32>
    %58 = vector.multi_reduction <add>, %52, %cst_31 [1] : vector<8x256xf32> to vector<8xf32>
    %59 = vector.shape_cast %58 : vector<8xf32> to vector<8x1xf32>
    %60 = arith.mulf %54, %59 : vector<8x1xf32>
    %61 = arith.subf %60, %57 : vector<8x1xf32>
    %c0_32 = arith.constant 0 : index
    %c0_33 = arith.constant 0 : index
    %62 = vector.load %arg13[%c0_32, %c0_33] : memref<8x1xf32, #tpu.memory_space<vmem>>, vector<8x1xf32>
    tpu.vector_store %arg13[%c0_32, %c0_33], %61 {strides = array<i32>} : memref<8x1xf32, #tpu.memory_space<vmem>>, vector<8x1xf32>,
    %cst_34 = arith.constant 1.000000e+00 : f32
    %63 = vector.broadcast %cst_34 : f32 to vector<8x64xf32>
    %64 = arith.addf %63, %24 : vector<8x64xf32>
    %65 = arith.mulf %23, %23 : vector<8x64xf32>
    %66 = arith.subf %64, %65 : vector<8x64xf32>
    %67 = math.exp %24 : vector<8x64xf32>
    %68 = arith.subf %66, %67 : vector<8x64xf32>
    %cst_35 = arith.constant dense<0.000000e+00> : vector<8xf32>
    %69 = vector.multi_reduction <add>, %68, %cst_35 [1] : vector<8x64xf32> to vector<8xf32>
    %70 = vector.shape_cast %69 : vector<8xf32> to vector<8x1xf32>
    %cst_36 = arith.constant -5.000000e-01 : f32
    %71 = vector.broadcast %cst_36 : f32 to vector<8x1xf32>
    %72 = arith.mulf %71, %70 : vector<8x1xf32>
    %c0_37 = arith.constant 0 : index
    %c0_38 = arith.constant 0 : index
    %73 = vector.load %arg14[%c0_37, %c0_38] : memref<8x1xf32, #tpu.memory_space<vmem>>, vector<8x1xf32>
    tpu.vector_store %arg14[%c0_37, %c0_38], %72 {strides = array<i32>} : memref<8x1xf32, #tpu.memory_space<vmem>>, vector<8x1xf32>,
    return
  }
  func.func @transform_0(%arg0: i32) -> (i32, i32) {
    %c0_i32 = arith.constant 0 : i32
    %c0_i32_0 = arith.constant 0 : i32
    return %arg0, %c0_i32 : i32, i32
  }
  func.func @transform_1(%arg0: i32) -> (i32, i32) {
    %c0_i32 = arith.constant 0 : i32
    %c0_i32_0 = arith.constant 0 : i32
    return %arg0, %c0_i32 : i32, i32
  }
  func.func @transform_2(%arg0: i32) -> (i32, i32) {
    %c0_i32 = arith.constant 0 : i32
    %c0_i32_0 = arith.constant 0 : i32
    %c0_i32_1 = arith.constant 0 : i32
    return %c0_i32, %c0_i32_0 : i32, i32
  }
  func.func @transform_3(%arg0: i32) -> (i32, i32) {
    %c0_i32 = arith.constant 0 : i32
    %c0_i32_0 = arith.constant 0 : i32
    %c0_i32_1 = arith.constant 0 : i32
    return %c0_i32, %c0_i32_0 : i32, i32
  }
  func.func @transform_4(%arg0: i32) -> (i32, i32) {
    %c0_i32 = arith.constant 0 : i32
    %c0_i32_0 = arith.constant 0 : i32
    %c0_i32_1 = arith.constant 0 : i32
    return %c0_i32, %c0_i32_0 : i32, i32
  }
  func.func @transform_5(%arg0: i32) -> (i32, i32) {
    %c0_i32 = arith.constant 0 : i32
    %c0_i32_0 = arith.constant 0 : i32
    %c0_i32_1 = arith.constant 0 : i32
    return %c0_i32, %c0_i32_0 : i32, i32
  }
  func.func @transform_6(%arg0: i32) -> (i32, i32) {
    %c0_i32 = arith.constant 0 : i32
    %c0_i32_0 = arith.constant 0 : i32
    %c0_i32_1 = arith.constant 0 : i32
    return %c0_i32, %c0_i32_0 : i32, i32
  }
  func.func @transform_7(%arg0: i32) -> (i32, i32) {
    %c0_i32 = arith.constant 0 : i32
    %c0_i32_0 = arith.constant 0 : i32
    %c0_i32_1 = arith.constant 0 : i32
    return %c0_i32, %c0_i32_0 : i32, i32
  }
  func.func @transform_8(%arg0: i32) -> (i32, i32) {
    %c0_i32 = arith.constant 0 : i32
    %c0_i32_0 = arith.constant 0 : i32
    %c0_i32_1 = arith.constant 0 : i32
    return %c0_i32, %c0_i32_0 : i32, i32
  }
  func.func @transform_9(%arg0: i32) -> (i32, i32) {
    %c0_i32 = arith.constant 0 : i32
    %c0_i32_0 = arith.constant 0 : i32
    %c0_i32_1 = arith.constant 0 : i32
    return %c0_i32, %c0_i32_0 : i32, i32
  }
  func.func @transform_10(%arg0: i32) -> (i32, i32) {
    %c0_i32 = arith.constant 0 : i32
    %c0_i32_0 = arith.constant 0 : i32
    return %arg0, %c0_i32 : i32, i32
  }
  func.func @transform_11(%arg0: i32) -> (i32, i32) {
    %c0_i32 = arith.constant 0 : i32
    %c0_i32_0 = arith.constant 0 : i32
    return %arg0, %c0_i32 : i32, i32
  }
  func.func @transform_12(%arg0: i32) -> (i32, i32) {
    %c0_i32 = arith.constant 0 : i32
    %c0_i32_0 = arith.constant 0 : i32
    return %arg0, %c0_i32 : i32, i32
  }
  func.func @transform_13(%arg0: i32) -> (i32, i32) {
    %c0_i32 = arith.constant 0 : i32
    %c0_i32_0 = arith.constant 0 : i32
    return %arg0, %c0_i32 : i32, i32
  }
}

</mosaic_0001>

<bundles_post_ra>
// kernel: tpu_custom_call.1
= control target key start
LH: loop header
LB: loop body
LE: loop exit
PB: predicated region body
PF: predicated region fallthrough
CT: control target
= control target key end

     0   :  { %19 = vsyncpa [#allocation3], 0  ;;  %s1283_s0 = inlined_call_operand.hbm [shape: bf16[8,256], index: 0, kind: input, shape index: {}]   ;;  %s1284_s1 = inlined_call_operand.hbm [shape: bf16[8,256], index: 1, kind: input, shape index: {}]   ;;  %s1285_s2 = inlined_call_operand.hbm [shape: bf16[256,128], index: 2, kind: input, shape index: {}]   ;;  %s1286_s3 = inlined_call_operand.vmem [shape: f32[1,128], index: 3, kind: input, shape index: {}]   ;;  %s1287_s4 = inlined_call_operand.hbm [shape: bf16[128,128], index: 4, kind: input, shape index: {}]   ;;  %s1288_s5 = inlined_call_operand.vmem [shape: f32[1,128], index: 5, kind: input, shape index: {}]   ;;  %s1289_s6 = inlined_call_operand.hbm [shape: bf16[64,128], index: 6, kind: input, shape index: {}]   ;;  %s1290_s7 = inlined_call_operand.vmem [shape: f32[1,128], index: 7, kind: input, shape index: {}]   ;;  %s1291_s8 = inlined_call_operand.hbm [shape: bf16[128,256], index: 8, kind: input, shape index: {}]   ;;  %s1292_s9 = inlined_call_operand.vmem [shape: f32[1,256], index: 9, kind: input, shape index: {}]   ;;  %s1293_s10 = inlined_call_operand.hbm [shape: f32[8,256], index: 10, kind: output, shape index: {0}]   ;;  %s1294_s11 = inlined_call_operand.hbm [shape: bf16[8,256], index: 11, kind: output, shape index: {1}]   ;;  %s1295_s12 = inlined_call_operand.vmem [shape: f32[8,1], index: 12, kind: output, shape index: {2}]   ;;  %s1296_s13 = inlined_call_operand.vmem [shape: f32[8,1], index: 13, kind: output, shape index: {3}]  }
   0x1   :  { %20 = vsyncpa [#allocation6], 0 }
   0x2   :  { %21 = vsyncpa [#allocation9], 0 }
   0x3   :  { %22 = vsyncpa [#allocation12], 0 }
   0x4   :  { %23 = vsyncpa [#allocation4], 0 }
   0x5   :  { %24 = vsyncpa [#allocation15], 0  ;;  %s1133_s25 = smov [#allocation5]  }
   0x6   :  { %s41_s26 = sshll.u32 %s1133_s25, 4  ;;  %s42_s26 = int_to_ptr.vmem [resolvable:$true] %s41_s26 }
   0x7   :  { %s969_s27 = scalar_lea.vmem %s42_s26, 128  ;;  %p974_p1 = scmp.lt.s32.totalorder %s42_s26, %s42_s26 }
   0x8   :  { %p970_p0 = scmp.ne.s32.totalorder %s42_s26, %s969_s27  ;;  %p975_p2 = scmp.lt.s32.totalorder %s969_s27, %s969_s27 }
   0xa   :  { %p976_p3 = por %p975_p2, %p974_p1 }
   0xc   :  { %p977_p4 = pnand %p976_p3, %p970_p0 }
   0xe   :  { %980 = shalt.err (!%p977_p4)
}
   0xf   :  { %44 = dma.hbm_to_vmem [thread:$0]  %s1284_s1, 128, %s42_s26, [#allocation6]  }
  0x10   :  { %s1134_s30 = smov [#allocation8]   ;;  %s1135_s15 = smov [#allocation2]  }
  0x11   :  { %s64_s14 = sshll.u32 %s1134_s30, 4  ;;  %s31_s16 = sshll.u32 %s1135_s15, 4  ;;  %s65_s14 = int_to_ptr.vmem [resolvable:$true] %s64_s14  ;;  %s32_s16 = int_to_ptr.vmem [resolvable:$true] %s31_s16 }
  0x12   :  { %s989_s17 = scalar_lea.vmem %s65_s14, 1024  ;;  %p994_p6 = scmp.lt.s32.totalorder %s65_s14, %s65_s14 }
  0x13   :  { %p990_p5 = scmp.ne.s32.totalorder %s65_s14, %s989_s17  ;;  %p995_p7 = scmp.lt.s32.totalorder %s989_s17, %s989_s17 }
  0x15   :  { %p996_p8 = por %p995_p7, %p994_p6 }
  0x17   :  { %p997_p9 = pnand %p996_p8, %p990_p5 }
  0x19   :  { %1000 = shalt.err (!%p997_p9)
}
  0x1a   :  { %s1136_s18 = smov 64   ;;  %s1137_s19 = smov 4  }
  0x1b   :  { %70 = dma.hbm_to_vmem [thread:$0]  %s1287_s4, 1024, %s65_s14, [#allocation9], %s1136_s18, %s1136_s18, %s1137_s19  }
  0x1c   :  { %s1009_s1 = scalar_lea.vmem %s32_s16, 128  ;;  %p1014_p11 = scmp.lt.s32.totalorder %s32_s16, %s32_s16 }
  0x1d   :  { %p1010_p10 = scmp.ne.s32.totalorder %s32_s16, %s1009_s1  ;;  %p1015_p12 = scmp.lt.s32.totalorder %s1009_s1, %s1009_s1 }
  0x1f   :  { %p1016_p13 = por %p1015_p12, %p1014_p11 }
  0x21   :  { %p1017_p0 = pnand %p1016_p13, %p1010_p10 }
  0x23   :  { %1020 = shalt.err (!%p1017_p0)
}
  0x24   :  { %34 = dma.hbm_to_vmem [thread:$0]  %s1283_s0, 128, %s32_s16, [#allocation3]  }
  0x25   :  { %s1138_s24 = smov [#allocation7]   ;;  %s1139_s26 = smov [#allocation10]  }
  0x26   :  { %s50_s25 = sshll.u32 %s1138_s24, 4  ;;  %s78_s27 = sshll.u32 %s1139_s26, 4  ;;  %s51_s25 = int_to_ptr.vmem [resolvable:$true] %s50_s25  ;;  %s79_s27 = int_to_ptr.vmem [resolvable:$true] %s78_s27 }
  0x27   :  { %s1029_s28 = scalar_lea.vmem %s51_s25, 2048  ;;  %p1034_p2 = scmp.lt.s32.totalorder %s51_s25, %s51_s25 }
  0x28   :  { %p1030_p1 = scmp.ne.s32.totalorder %s51_s25, %s1029_s28  ;;  %p1035_p3 = scmp.lt.s32.totalorder %s1029_s28, %s1029_s28 }
  0x2a   :  { %p1036_p4 = por %p1035_p3, %p1034_p2 }
  0x2c   :  { %p1037_p5 = pnand %p1036_p4, %p1030_p1 }
  0x2e   :  { %1040 = shalt.err (!%p1037_p5)
}
  0x2f   :  { %56 = dma.hbm_to_vmem [thread:$0]  %s1285_s2, 2048, %s51_s25, [#allocation6], %s1136_s18, %s1136_s18, %s1137_s19  }
  0x30   :  { %s1049_s0 = scalar_lea.vmem %s79_s27, 512  ;;  %p1054_p7 = scmp.lt.s32.totalorder %s79_s27, %s79_s27 }
  0x31   :  { %p1050_p6 = scmp.ne.s32.totalorder %s79_s27, %s1049_s0  ;;  %p1055_p8 = scmp.lt.s32.totalorder %s1049_s0, %s1049_s0 }
  0x33   :  { %p1056_p9 = por %p1055_p8, %p1054_p7 }
  0x35   :  { %p1057_p10 = pnand %p1056_p9, %p1050_p6 }
  0x37   :  { %1060 = shalt.err (!%p1057_p10)
}
  0x38   :  { %84 = dma.hbm_to_vmem [thread:$0]  %s1289_s6, 512, %s79_s27, [#allocation9], %s1136_s18, %s1136_s18, %s1137_s19  }
  0x39   :  { %s1140_s15 = smov [#allocation11]  }
  0x3a   :  { %s92_s16 = sshll.u32 %s1140_s15, 4  ;;  %s93_s16 = int_to_ptr.vmem [resolvable:$true] %s92_s16 }
  0x3b   :  { %s1069_s17 = scalar_lea.vmem %s93_s16, 2048  ;;  %p1074_p12 = scmp.lt.s32.totalorder %s93_s16, %s93_s16 }
  0x3c   :  { %p1070_p11 = scmp.ne.s32.totalorder %s93_s16, %s1069_s17  ;;  %p1075_p13 = scmp.lt.s32.totalorder %s1069_s17, %s1069_s17 }
  0x3e   :  { %p1076_p0 = por %p1075_p13, %p1074_p12 }
  0x40   :  { %p1077_p1 = pnand %p1076_p0, %p1070_p11 }
  0x42   :  { %1080 = shalt.err (!%p1077_p1)
}
  0x43   :  { %s1141_s2 = smov 128   ;;  %s1142_s20 = smov 8  }
  0x44   :  { %98 = dma.hbm_to_vmem [thread:$0]  %s1291_s8, 2048, %s93_s16, [#allocation12], %s1141_s2, %s1141_s2, %s1142_s20  }
  0x45   :  { %1121 = dma.done.wait [#allocation3], 128  }
  0x46   :  { %1122 = vsyncadd [#allocation3], 4294967168 }
  0x47   :  { %1123 = dma.done.wait [#allocation6], 2176  }
  0x48   :  { %1124 = vsyncadd [#allocation6], 4294965120 }
  0x49   :  { %1125 = dma.done.wait [#allocation9], 1536  }
  0x4a   :  { %1126 = vsyncadd [#allocation9], 4294965760 }
  0x4b   :  { %1127 = dma.done.wait [#allocation12], 2048  }
  0x4c   :  { %1128 = vsyncadd [#allocation12], 4294965248  ;;  %v120_v0 = vld [vmem:[#allocation2] sm:$0xff]  ;;  %v893_v3 = vld [vmem:[#allocation7 + $0x78] sm:$0xff]   ;;  %v1143_v23 = vmov 0.0   ;;  %vm1144_vm0 = vmmov 0  }
  0x4d   :  { %v121_v1 = vunpack.c.l.bf16 %v120_v0  ;;  %v122_v2 = vunpack.c.h.bf16 %v120_v0  ;;  %v894_v4 = vld [vmem:[#allocation7 + $0x38] sm:$0xff]   ;;  %810 = vmatprep.subr.bf16.mxu0 %v893_v3  ;;  %v895_v7 = vld [vmem:[#allocation7 + $0x70] sm:$0xff]   ;;  %v897_v10 = vld [vmem:[#allocation7 + $0x68] sm:$0xff]   ;;  %846 = vmatprep.subr.bf16.mxu1 %v1143_v23  ;;  %vm462_vm1 = vcmask 523264  }
  0x4e   :  { %811 = vmatpush3.bf16.msra.mxu0 %v894_v4  ;;  %v896_v8 = vld [vmem:[#allocation7 + $0x30] sm:$0xff]   ;;  %v898_v11 = vld [vmem:[#allocation7 + $0x28] sm:$0xff]   ;;  %v899_v12 = vld [vmem:[#allocation7 + $0x60] sm:$0xff]   ;;  %862 = vmatprep.mubr.msk.bf16.mxu1 %vm1144_vm0, %v1143_v23 }
  0x4f   :  { %v123_v5 = vmul.f32 %v121_v1, %v121_v1  ;;  %v124_v6 = vmul.f32 %v122_v2, %v122_v2  ;;  %812 = vmatprep.subr.bf16.mxu0 %v895_v7  ;;  %v900_v13 = vld [vmem:[#allocation7 + $0x20] sm:$0xff]   ;;  %v901_v14 = vld [vmem:[#allocation7 + $0x58] sm:$0xff]   ;;  %v903_v16 = vld [vmem:[#allocation7 + $0x50] sm:$0xff]  }
  0x50   :  { %v902_v15 = vld [vmem:[#allocation7 + $0x18] sm:$0xff]   ;;  %v904_v17 = vld [vmem:[#allocation7 + $0x10] sm:$0xff]   ;;  %v905_v18 = vld [vmem:[#allocation7 + $0x48] sm:$0xff]  }
  0x51   :  { %v125_v9 = vadd.f32 %v124_v6, %v123_v5  ;;  %v906_v19 = vld [vmem:[#allocation7 + $0x8] sm:$0xff]   ;;  %v907_v20 = vld [vmem:[#allocation7 + $0x40] sm:$0xff]   ;;  %v909_v22 = vld [vmem:[#allocation8 + $0x38] sm:$0xff]  }
  0x52   :  { %813 = vmatpush3.bf16.msra.mxu0 %v896_v8  ;;  %v908_v21 = vld [vmem:[#allocation7] sm:$0xff]   ;;  %847 = vmatpush3.bf16.msra.mxu1 %v909_v22  ;;  %v910_v24 = vld [vmem:[#allocation8 + $0x30] sm:$0xff]   ;;  %v911_v32 = vld [vmem:[#allocation8 + $0x28] sm:$0xff]  }
  0x53   :  { %126 = vadd.xlane.f32.xlu0 %v125_v9  ;;  %814 = vmatprep.subr.bf16.mxu0 %v897_v10  ;;  %v912_v33 = vld [vmem:[#allocation8 + $0x20] sm:$0xff]   ;;  %v913_v34 = vld [vmem:[#allocation8 + $0x18] sm:$0xff]   ;;  %v914_v35 = vld [vmem:[#allocation8 + $0x10] sm:$0xff]  }
  0x54   :  { %848 = vmatprep.subr.bf16.mxu1 %v1143_v23  ;;  %v915_v36 = vld [vmem:[#allocation8 + $0x8] sm:$0xff]   ;;  %v916_v37 = vld [vmem:[#allocation8] sm:$0xff]   ;;  %v917_v38 = vld [vmem:[#allocation10 + $0x18] sm:$0xff]  }
  0x55   :  { %v918_v39 = vld [vmem:[#allocation10 + $0x10] sm:$0xff]   ;;  %v919_v40 = vld [vmem:[#allocation10 + $0x8] sm:$0xff]   ;;  %v920_v50 = vld [vmem:[#allocation10] sm:$0xff]  }
  0x56   :  { %815 = vmatpush3.bf16.msra.mxu0 %v898_v11  ;;  %849 = vmatpush3.bf16.msra.mxu1 %v910_v24  ;;  %v760_v42 = vld [vmem:[%s1286_s3] ss:$0 sm:$0xff]  ;;  %v923_v52 = vld [vmem:[#allocation11 + $0x74] ss:$8 sps:$4 sm:$0xff]   ;;  %v926_v53 = vld [vmem:[#allocation11 + $0x64] ss:$8 sps:$4 sm:$0xff]   ;;  %v526_v24 = vlaneseq }
  0x57   :  { %816 = vmatprep.subr.bf16.mxu0 %v899_v12  ;;  %850 = vmatprep.subr.bf16.mxu1 %v1143_v23  ;;  %v921_v51 = vld [vmem:[#allocation11 + $0x70] ss:$8 sps:$4 sm:$0xff]   ;;  %v924_v54 = vld [vmem:[#allocation11 + $0x60] ss:$8 sps:$4 sm:$0xff]   ;;  %v929_v55 = vld [vmem:[#allocation11 + $0x54] ss:$8 sps:$4 sm:$0xff]  }
  0x58   :  { %v777_v56 = vld [vmem:[%s1288_s5] ss:$0 sm:$0xff]  ;;  %v932_v59 = vld [vmem:[#allocation11 + $0x44] ss:$8 sps:$4 sm:$0xff]   ;;  %v930_v0 = vld [vmem:[#allocation11 + $0x40] ss:$8 sps:$4 sm:$0xff]  }
  0x59   :  { %v927_v57 = vld [vmem:[#allocation11 + $0x50] ss:$8 sps:$4 sm:$0xff]   ;;  %v935_v3 = vld [vmem:[#allocation11 + $0x34] ss:$8 sps:$4 sm:$0xff]   ;;  %v938_v5 = vld [vmem:[#allocation11 + $0x24] ss:$8 sps:$4 sm:$0xff]  }
  0x5a   :  { %817 = vmatpush3.bf16.msra.mxu0 %v900_v13  ;;  %851 = vmatpush3.bf16.msra.mxu1 %v911_v32  ;;  %v933_v4 = vld [vmem:[#allocation11 + $0x30] ss:$8 sps:$4 sm:$0xff]   ;;  %v936_v6 = vld [vmem:[#allocation11 + $0x20] ss:$8 sps:$4 sm:$0xff]   ;;  %v941_v7 = vld [vmem:[#allocation11 + $0x14] ss:$8 sps:$4 sm:$0xff]  }
  0x5b   :  { %818 = vmatprep.subr.bf16.mxu0 %v901_v14  ;;  %852 = vmatprep.subr.bf16.mxu1 %v1143_v23  ;;  %v939_v8 = vld [vmem:[#allocation11 + $0x10] ss:$8 sps:$4 sm:$0xff]   ;;  %v944_v9 = vld [vmem:[#allocation11 + $0x4] ss:$8 sps:$4 sm:$0xff]   ;;  %v942_v10 = vld [vmem:[#allocation11] ss:$8 sps:$4 sm:$0xff]  }
  0x5c   :  { %v1145_v11 = vmov 0   ;;  %v786_v12 = vld [vmem:[%s1290_s7] ss:$0 sm:$0xff]  ;;  %s1146_s7 = smov [#allocation13]  }
  0x5e   :  { %819 = vmatpush3.bf16.msra.mxu0 %v902_v15  ;;  %853 = vmatpush3.bf16.msra.mxu1 %v912_v33 }
  0x5f   :  { %820 = vmatprep.subr.bf16.mxu0 %v903_v16  ;;  %854 = vmatprep.subr.bf16.mxu1 %v1143_v23 }
  0x62   :  { %821 = vmatpush3.bf16.msra.mxu0 %v904_v17  ;;  %855 = vmatpush3.bf16.msra.mxu1 %v913_v34 }
  0x63   :  { %822 = vmatprep.subr.bf16.mxu0 %v905_v18  ;;  %856 = vmatprep.subr.bf16.mxu1 %v1143_v23 }
  0x66   :  { %823 = vmatpush3.bf16.msra.mxu0 %v906_v19  ;;  %857 = vmatpush3.bf16.msra.mxu1 %v914_v35 }
  0x67   :  { %824 = vmatprep.subr.bf16.mxu0 %v907_v20  ;;  %858 = vmatprep.subr.bf16.mxu1 %v1143_v23  ;;  %v683_v20 = vld [vmem:[#allocation5] sm:$0xff] }
  0x68   :  { %v685_v22 = vunpack.c.h.bf16 %v683_v20 }
  0x6a   :  { %825 = vmatpush3.bf16.msra.mxu0 %v908_v21  ;;  %859 = vmatpush3.bf16.msra.mxu1 %v915_v36  ;;  %v684_v21 = vunpack.c.l.bf16 %v683_v20 }
  0x6b   :  { %866 = vmatprep.subr.bf16.mxu0 %v1143_v23  ;;  %860 = vmatprep.subr.bf16.mxu1 %v1143_v23 }
  0x6e   :  { %861 = vmatpush3.bf16.msra.mxu1 %v916_v37 }
  0x6f   :  { %616 = vmatprep.subr.bf16.mxu1 %v923_v52 }
  0xdc   :  { %v127_v25 = vpop.xlane.xlu0 %126 }
  0xdd   :  { %v128_v26 = vadd.f32 1e-24, %v127_v25  ;;  %v527_v25 = vshrl.u32 %v526_v24, 7 }
  0xdf   :  { %945 = vrsqrt.f32 %v128_v26  ;;  %v528_v26 = vsub.s32 0, %v527_v25 }
  0xec   :  { %v946_v27 = vpop.eup %945 }
  0xed   :  { %v131_v28 = vmul.f32 %v946_v27, %v122_v2  ;;  %v130_v29 = vmul.f32 %v946_v27, %v121_v1  ;;  %v524_v27 = vld [vmem:[%s1292_s9] sm:$0x3]  ;;  %s726_s9 = sshll.u32 %s1146_s7, 4  ;;  %s727_s9 = int_to_ptr.vmem [resolvable:$true] %s726_s9 }
  0xee   :  { %s1081_s25 = scalar_lea.vmem %s727_s9, 256  ;;  %p1086_p3 = scmp.lt.s32.totalorder %s727_s9, %s727_s9 }
  0xef   :  { %v133_v30 = vpack.c.bf16 %v131_v28, %v131_v28  ;;  %v132_v31 = vpack.c.bf16 %v130_v29, %v130_v29  ;;  %v532_v28 = vsub.s32 1, %v527_v25  ;;  %v529_v29 = vrot.slane %v524_v27, %v528_v26  ;;  %p1082_p2 = scmp.ne.s32.totalorder %s727_s9, %s1081_s25  ;;  %p1087_p4 = scmp.lt.s32.totalorder %s1081_s25, %s1081_s25 }
  0xf1   :  { %301 = vmatprep.mubr.bf16.mxu0 %v133_v30  ;;  %v533_v30 = vrot.slane %v524_v27, %v532_v28  ;;  %p1088_p5 = por %p1087_p4, %p1086_p3 }
  0xf2   :  { %302 = vmatmul.mubr.bf16.vlgmr.msra.gmra.mxu0 %v132_v31 }
  0xf3   :  { %874 = vmatprep.mubr.msk.bf16.mxu0 %vm1144_vm0, %v1143_v23  ;;  %867 = vmatpush3.bf16.msra.mxu0 %v917_v38  ;;  %p1089_p6 = pnand %p1088_p5, %p1082_p2 }
  0xf4   :  { %868 = vmatprep.subr.bf16.mxu0 %v1143_v23 }
  0xf7   :  { %869 = vmatpush3.bf16.msra.mxu0 %v918_v39 }
  0xf8   :  { %870 = vmatprep.subr.bf16.mxu0 %v1143_v23 }
  0xfb   :  { %871 = vmatpush3.bf16.msra.mxu0 %v919_v40 }
  0xfc   :  { %872 = vmatprep.subr.bf16.mxu0 %v1143_v23  ;;  %v694_v23 = vadd.f32 %v685_v22, %v684_v21 }
  0xff   :  { %873 = vmatpush3.bf16.msra.mxu0 %v920_v50 }
 0x1b2   :  { %v826_v41 = vpop.f32.mrf.mxu0 }
 0x1b4   :  { %v827_v43 = vpop.f32.mrf.mxu0 }
 0x1b5   :  { %v828_v44 = vadd.f32 %v827_v43, %v826_v41 }
 0x1b6   :  { %v829_v45 = vpop.f32.mrf.mxu0 }
 0x1b7   :  { %v304_v46 = vadd.f32 %v828_v44, %v760_v42 }
 0x1b8   :  { %v830_v47 = vpop.f32.mrf.mxu0 }
 0x1b9   :  { %947 = vtanh.f32 %v304_v46 }
 0x1c6   :  { %v948_v48 = vpop.eup %947 }
 0x1c7   :  { %v310_v49 = vpack.c.bf16 %v948_v48, %v948_v48 }
 0x1c9   :  { %863 = vmatmul.mubr.bf16.vlgmr.msra.gmra.mxu1 %v310_v49 }
 0x1ca   :  { %617 = vmatpush1.bf16.msra.mxu1 %v921_v51  ;;  %648 = vmatprep.mubr.bf16.mxu1 %v1145_v11 }
 0x1cb   :  { %618 = vmatprep.subr.bf16.mxu1 %v926_v53 }
 0x1ce   :  { %619 = vmatpush1.bf16.msra.mxu1 %v924_v54 }
 0x1cf   :  { %620 = vmatprep.subr.bf16.mxu1 %v929_v55 }
 0x1d2   :  { %621 = vmatpush1.bf16.msra.mxu1 %v927_v57 }
 0x1d3   :  { %622 = vmatprep.subr.bf16.mxu1 %v932_v59 }
 0x1d6   :  { %623 = vmatpush1.bf16.msra.mxu1 %v930_v0 }
 0x1d7   :  { %624 = vmatprep.subr.bf16.mxu1 %v935_v3 }
 0x1da   :  { %625 = vmatpush1.bf16.msra.mxu1 %v933_v4 }
 0x1db   :  { %626 = vmatprep.subr.bf16.mxu1 %v938_v5 }
 0x1de   :  { %627 = vmatpush1.bf16.msra.mxu1 %v936_v6 }
 0x1df   :  { %628 = vmatprep.subr.bf16.mxu1 %v941_v7 }
 0x1e2   :  { %629 = vmatpush1.bf16.msra.mxu1 %v939_v8 }
 0x1e3   :  { %630 = vmatprep.subr.bf16.mxu1 %v944_v9 }
 0x1e6   :  { %631 = vmatpush1.bf16.msra.mxu1 %v942_v10 }
 0x289   :  { %v416_v58 = vpop.f32.mrf.mxu1 }
 0x28a   :  { %v1251_v60 = vadd.f32 %v777_v56, %v416_v58 }
 0x28b   :  { %v864_v61 = vpop.f32.mrf.mxu1 }
 0x28c   :  { %v422_v62 = vpack.c.bf16 %v1251_v60, %v1251_v60  ;;  %v702_v63 = vmul.f32 %v1251_v60, %v1251_v60  ;;  %v708_v35 = vmul.f32 1.442695, %v1251_v60  ;;  %v701_v43 = vadd.f32 1.0, %v1251_v60 }
 0x28d   :  { %v419_v1 = vpop.f32.mrf.mxu1 }
 0x28e   :  { %704 = vrot.lane.b32.xlu0 %v702_v63, %s1136_s18  ;;  %875 = vmatmul.mubr.msk.bf16.vlgmr.msra.gmra.mxu0 %vm462_vm1, %v422_v62 }
 0x28f   :  { %v865_v2 = vpop.f32.mrf.mxu1 }
 0x2ad   :  { %695 = vadd.xlane.f32.xlu0 %v694_v23 }
 0x300   :  { %v705_v42 = vpop.permute.xlu0 %704 }
 0x301   :  { %v707_v44 = vsub.f32 %v701_v43, %v705_v42 }
 0x34e   :  { %v500_v13 = vpop.f32.mrf.mxu0 }
 0x34f   :  { %v501_v14 = vadd.f32 %v786_v12, %v500_v13 }
 0x350   :  { %v876_v15 = vpop.f32.mrf.mxu0 }
 0x351   :  { %949 = vtanh.f32 %v501_v14 }
 0x352   :  { %v503_v16 = vpop.f32.mrf.mxu0  ;;  %951 = vpow2.f32 %v708_v35 }
 0x354   :  { %v877_v17 = vpop.f32.mrf.mxu0 }
 0x35e   :  { %v950_v18 = vpop.eup %949 }
 0x35f   :  { %v507_v19 = vpack.c.bf16 %v950_v18, %v950_v18  ;;  %v952_v45 = vpop.eup %951 }
 0x360   :  { %v710_v46 = vsub.f32 %v707_v44, %v952_v45 }
 0x361   :  { %649 = vmatmul.mubr.bf16.vlgmr.msra.gmra.mxu1 %v507_v19 }
 0x421   :  { %v650_v31 = vpop.f32.mrf.mxu1 }
 0x422   :  { %v651_v32 = vadd.f32 %v650_v31, %v529_v29 }
 0x423   :  { %v652_v33 = vpop.f32.mrf.mxu1 }
 0x424   :  { %657 = vst [vmem:[#allocation13] sm:$0xff] %v651_v32  ;;  %v653_v34 = vadd.f32 %v652_v33, %v533_v30  ;;  %v689_v38 = vmul.f32 %v684_v21, %v651_v32 }
 0x425   :  { %v654_v36 = vpop.f32.mrf.mxu1 }
 0x426   :  { %658 = vst [vmem:[#allocation13 + $0x8] sm:$0xff] %v653_v34  ;;  %v659_v37 = vmax.f32 %v651_v32, %v653_v34  ;;  %v690_v39 = vmul.f32 %v685_v22, %v653_v34 }
 0x427   :  { %v655_v40 = vpop.f32.mrf.mxu1 }
 0x428   :  { %660 = vmax.xlane.f32.xlu1 %v659_v37  ;;  %v691_v41 = vadd.f32 %v690_v39, %v689_v38 }
 0x42a   :  { %692 = vadd.xlane.f32.xlu0 %v691_v41 }
 0x439   :  { %712 = vrot.lane.b32.xlu1 %v710_v46, %s1136_s18 }
 0x4b1   :  { %v661_v47 = vpop.xlane.xlu1 %660 }
 0x4b2   :  { %v662_v48 = vsub.f32 %v651_v32, %v661_v47  ;;  %v663_v49 = vsub.f32 %v653_v34, %v661_v47 }
 0x4b4   :  { %v664_v50 = vmul.f32 1.442695, %v662_v48  ;;  %v666_v51 = vmul.f32 1.442695, %v663_v49 }
 0x4b5   :  { %v713_v55 = vpop.permute.xlu1 %712 }
 0x4b6   :  { %953 = vpow2.f32 %v664_v50  ;;  %v715_v56 = vsel %vm462_vm1, %v713_v55, 0.0 }
 0x4b7   :  { %955 = vpow2.f32 %v666_v51 }
 0x4c3   :  { %v954_v52 = vpop.eup %953 }
 0x4c4   :  { %v956_v53 = vpop.eup %955 }
 0x4c5   :  { %v668_v54 = vadd.f32 %v956_v53, %v954_v52 }
 0x4c7   :  { %669 = vadd.xlane.f32.xlu1 %v668_v54 }
 0x4cb   :  { %716 = vadd.xlane.f32.xlu1 %v715_v56 }
 0x4cc   :  { %1092 = shalt.err (!%p1089_p6)
}
 0x4cd   :  { %729 = dma.vmem_to_hbm [thread:$0]  %s727_s9, 256, %s1293_s10, [#allocation4]   ;;  %vm699_vm2 = vcmask 7168   ;;  %v696_v62 = vpop.xlane.xlu0 %695 }
 0x4ce   :  { %s1147_s4 = smov [#allocation14]  }
 0x4cf   :  { %s736_s29 = sshll.u32 %s1147_s4, 4  ;;  %s737_s29 = int_to_ptr.vmem [resolvable:$true] %s736_s29 }
 0x4d0   :  { %s1101_s10 = scalar_lea.vmem %s737_s29, 128  ;;  %p1106_p8 = scmp.lt.s32.totalorder %s737_s29, %s737_s29 }
 0x4d1   :  { %p1102_p7 = scmp.ne.s32.totalorder %s737_s29, %s1101_s10  ;;  %p1107_p9 = scmp.lt.s32.totalorder %s1101_s10, %s1101_s10 }
 0x4d3   :  { %p1108_p10 = por %p1107_p9, %p1106_p8 }
 0x4d5   :  { %p1109_p11 = pnand %p1108_p10, %p1102_p7 }
 0x550   :  { %v670_v57 = vpop.xlane.xlu1 %669 }
 0x551   :  { %957 = vrcp.f32 %v670_v57 }
 0x552   :  { %959 = vlog2.f32 %v670_v57 }
 0x554   :  { %v717_v58 = vpop.xlane.xlu1 %716 }
 0x555   :  { %v718_v59 = vmul.f32 -0.5, %v717_v58 }
 0x557   :  { %719 = vst.msk [vmem:[%s1296_s13] sm:$0xff] %vm699_vm2, %v718_v59 }
 0x55e   :  { %v958_v60 = vpop.eup %957 }
 0x55f   :  { %v960_v61 = vpop.eup %959  ;;  %v672_v63 = vmul.f32 %v958_v60, %v954_v52  ;;  %v673_v0 = vmul.f32 %v958_v60, %v956_v53 }
 0x560   :  { %v687_v1 = vmul.f32 0.6931472, %v960_v61 }
 0x561   :  { %v809_v2 = vpack.c.bf16 %v673_v0, %v672_v63 }
 0x562   :  { %v688_v3 = vadd.f32 %v687_v1, %v661_v47 }
 0x563   :  { %682 = vst [vmem:[#allocation14] sm:$0xff] %v809_v2 }
 0x564   :  { %v697_v4 = vmul.f32 %v696_v62, %v688_v3 }
 0x565   :  { %1112 = shalt.err (!%p1109_p11)
}
 0x566   :  { %739 = dma.vmem_to_hbm [thread:$0]  %s737_s29, 128, %s1294_s11, [#allocation15]   ;;  %v693_v5 = vpop.xlane.xlu0 %692 }
 0x567   :  { %v698_v6 = vsub.f32 %v697_v4, %v693_v5 }
 0x569   :  { %700 = vst.msk [vmem:[%s1295_s12] sm:$0xff] %vm699_vm2, %v698_v6 }
 0x56a   :  { %1129 = dma.done.wait [#allocation4], 256  }
 0x56b   :  { %1130 = vsyncadd [#allocation4], 4294967040 }
 0x56c   :  { %1131 = dma.done.wait [#allocation15], 128  }
 0x56d   :  { %1132 = vsyncadd [#allocation15], 4294967168 }
 0x56e   :  { %754 = vsyncpa [#allocation3], 1 }
 0x56f   :  { %755 = vsyncpa [#allocation6], 1 }
 0x570   :  { %756 = vsyncpa [#allocation9], 1 }
 0x571   :  { %757 = vsyncpa [#allocation12], 1 }
 0x572   :  { %758 = vsyncpa [#allocation4], 1 }
 0x573   :  { %759 = vsyncpa [#allocation15], 1 }

// kernel: tpu_custom_call.1
= control target key start
LH: loop header
LB: loop body
LE: loop exit
PB: predicated region body
PF: predicated region fallthrough
CT: control target
= control target key end

     0   :  { %19 = vsyncpa [#allocation3], 0  ;;  %s1283_s0 = inlined_call_operand.hbm [shape: bf16[8,256], index: 0, kind: input, shape index: {}]   ;;  %s1284_s1 = inlined_call_operand.hbm [shape: bf16[8,256], index: 1, kind: input, shape index: {}]   ;;  %s1285_s2 = inlined_call_operand.hbm [shape: bf16[256,128], index: 2, kind: input, shape index: {}]   ;;  %s1286_s3 = inlined_call_operand.vmem [shape: f32[1,128], index: 3, kind: input, shape index: {}]   ;;  %s1287_s4 = inlined_call_operand.hbm [shape: bf16[128,128], index: 4, kind: input, shape index: {}]   ;;  %s1288_s5 = inlined_call_operand.vmem [shape: f32[1,128], index: 5, kind: input, shape index: {}]   ;;  %s1289_s6 = inlined_call_operand.hbm [shape: bf16[64,128], index: 6, kind: input, shape index: {}]   ;;  %s1290_s7 = inlined_call_operand.vmem [shape: f32[1,128], index: 7, kind: input, shape index: {}]   ;;  %s1291_s8 = inlined_call_operand.hbm [shape: bf16[128,256], index: 8, kind: input, shape index: {}]   ;;  %s1292_s9 = inlined_call_operand.vmem [shape: f32[1,256], index: 9, kind: input, shape index: {}]   ;;  %s1293_s10 = inlined_call_operand.hbm [shape: f32[8,256], index: 10, kind: output, shape index: {0}]   ;;  %s1294_s11 = inlined_call_operand.hbm [shape: bf16[8,256], index: 11, kind: output, shape index: {1}]   ;;  %s1295_s12 = inlined_call_operand.vmem [shape: f32[8,1], index: 12, kind: output, shape index: {2}]   ;;  %s1296_s13 = inlined_call_operand.vmem [shape: f32[8,1], index: 13, kind: output, shape index: {3}]  }
   0x1   :  { %20 = vsyncpa [#allocation6], 0 }
   0x2   :  { %21 = vsyncpa [#allocation9], 0 }
   0x3   :  { %22 = vsyncpa [#allocation12], 0 }
   0x4   :  { %23 = vsyncpa [#allocation4], 0 }
   0x5   :  { %24 = vsyncpa [#allocation15], 0  ;;  %s1133_s25 = smov [#allocation5]  }
   0x6   :  { %s41_s26 = sshll.u32 %s1133_s25, 4  ;;  %s42_s26 = int_to_ptr.vmem [resolvable:$true] %s41_s26 }
   0x7   :  { %s969_s27 = scalar_lea.vmem %s42_s26, 128  ;;  %p974_p1 = scmp.lt.s32.totalorder %s42_s26, %s42_s26 }
   0x8   :  { %p970_p0 = scmp.ne.s32.totalorder %s42_s26, %s969_s27  ;;  %p975_p2 = scmp.lt.s32.totalorder %s969_s27, %s969_s27 }
   0xa   :  { %p976_p3 = por %p975_p2, %p974_p1 }
   0xc   :  { %p977_p4 = pnand %p976_p3, %p970_p0 }
   0xe   :  { %980 = shalt.err (!%p977_p4)
}
   0xf   :  { %44 = dma.hbm_to_vmem [thread:$0]  %s1284_s1, 128, %s42_s26, [#allocation6]  }
  0x10   :  { %s1134_s30 = smov [#allocation8]   ;;  %s1135_s15 = smov [#allocation2]  }
  0x11   :  { %s64_s14 = sshll.u32 %s1134_s30, 4  ;;  %s31_s16 = sshll.u32 %s1135_s15, 4  ;;  %s65_s14 = int_to_ptr.vmem [resolvable:$true] %s64_s14  ;;  %s32_s16 = int_to_ptr.vmem [resolvable:$true] %s31_s16 }
  0x12   :  { %s989_s17 = scalar_lea.vmem %s65_s14, 1024  ;;  %p994_p6 = scmp.lt.s32.totalorder %s65_s14, %s65_s14 }
  0x13   :  { %p990_p5 = scmp.ne.s32.totalorder %s65_s14, %s989_s17  ;;  %p995_p7 = scmp.lt.s32.totalorder %s989_s17, %s989_s17 }
  0x15   :  { %p996_p8 = por %p995_p7, %p994_p6 }
  0x17   :  { %p997_p9 = pnand %p996_p8, %p990_p5 }
  0x19   :  { %1000 = shalt.err (!%p997_p9)
}
  0x1a   :  { %s1136_s18 = smov 64   ;;  %s1137_s19 = smov 4  }
  0x1b   :  { %70 = dma.hbm_to_vmem [thread:$0]  %s1287_s4, 1024, %s65_s14, [#allocation9], %s1136_s18, %s1136_s18, %s1137_s19  }
  0x1c   :  { %s1009_s1 = scalar_lea.vmem %s32_s16, 128  ;;  %p1014_p11 = scmp.lt.s32.totalorder %s32_s16, %s32_s16 }
  0x1d   :  { %p1010_p10 = scmp.ne.s32.totalorder %s32_s16, %s1009_s1  ;;  %p1015_p12 = scmp.lt.s32.totalorder %s1009_s1, %s1009_s1 }
  0x1f   :  { %p1016_p13 = por %p1015_p12, %p1014_p11 }
  0x21   :  { %p1017_p0 = pnand %p1016_p13, %p1010_p10 }
  0x23   :  { %1020 = shalt.err (!%p1017_p0)
}
  0x24   :  { %34 = dma.hbm_to_vmem [thread:$0]  %s1283_s0, 128, %s32_s16, [#allocation3]  }
  0x25   :  { %s1138_s24 = smov [#allocation7]   ;;  %s1139_s26 = smov [#allocation10]  }
  0x26   :  { %s50_s25 = sshll.u32 %s1138_s24, 4  ;;  %s78_s27 = sshll.u32 %s1139_s26, 4  ;;  %s51_s25 = int_to_ptr.vmem [resolvable:$true] %s50_s25  ;;  %s79_s27 = int_to_ptr.vmem [resolvable:$true] %s78_s27 }
  0x27   :  { %s1029_s28 = scalar_lea.vmem %s51_s25, 2048  ;;  %p1034_p2 = scmp.lt.s32.totalorder %s51_s25, %s51_s25 }
  0x28   :  { %p1030_p1 = scmp.ne.s32.totalorder %s51_s25, %s1029_s28  ;;  %p1035_p3 = scmp.lt.s32.totalorder %s1029_s28, %s1029_s28 }
  0x2a   :  { %p1036_p4 = por %p1035_p3, %p1034_p2 }
  0x2c   :  { %p1037_p5 = pnand %p1036_p4, %p1030_p1 }
  0x2e   :  { %1040 = shalt.err (!%p1037_p5)
}
  0x2f   :  { %56 = dma.hbm_to_vmem [thread:$0]  %s1285_s2, 2048, %s51_s25, [#allocation6], %s1136_s18, %s1136_s18, %s1137_s19  }
  0x30   :  { %s1049_s0 = scalar_lea.vmem %s79_s27, 512  ;;  %p1054_p7 = scmp.lt.s32.totalorder %s79_s27, %s79_s27 }
  0x31   :  { %p1050_p6 = scmp.ne.s32.totalorder %s79_s27, %s1049_s0  ;;  %p1055_p8 = scmp.lt.s32.totalorder %s1049_s0, %s1049_s0 }
  0x33   :  { %p1056_p9 = por %p1055_p8, %p1054_p7 }
  0x35   :  { %p1057_p10 = pnand %p1056_p9, %p1050_p6 }
  0x37   :  { %1060 = shalt.err (!%p1057_p10)
}
  0x38   :  { %84 = dma.hbm_to_vmem [thread:$0]  %s1289_s6, 512, %s79_s27, [#allocation9], %s1136_s18, %s1136_s18, %s1137_s19  }
  0x39   :  { %s1140_s15 = smov [#allocation11]  }
  0x3a   :  { %s92_s16 = sshll.u32 %s1140_s15, 4  ;;  %s93_s16 = int_to_ptr.vmem [resolvable:$true] %s92_s16 }
  0x3b   :  { %s1069_s17 = scalar_lea.vmem %s93_s16, 2048  ;;  %p1074_p12 = scmp.lt.s32.totalorder %s93_s16, %s93_s16 }
  0x3c   :  { %p1070_p11 = scmp.ne.s32.totalorder %s93_s16, %s1069_s17  ;;  %p1075_p13 = scmp.lt.s32.totalorder %s1069_s17, %s1069_s17 }
  0x3e   :  { %p1076_p0 = por %p1075_p13, %p1074_p12 }
  0x40   :  { %p1077_p1 = pnand %p1076_p0, %p1070_p11 }
  0x42   :  { %1080 = shalt.err (!%p1077_p1)
}
  0x43   :  { %s1141_s2 = smov 128   ;;  %s1142_s20 = smov 8  }
  0x44   :  { %98 = dma.hbm_to_vmem [thread:$0]  %s1291_s8, 2048, %s93_s16, [#allocation12], %s1141_s2, %s1141_s2, %s1142_s20  }
  0x45   :  { %1121 = dma.done.wait [#allocation3], 128  }
  0x46   :  { %1122 = vsyncadd [#allocation3], 4294967168 }
  0x47   :  { %1123 = dma.done.wait [#allocation6], 2176  }
  0x48   :  { %1124 = vsyncadd [#allocation6], 4294965120 }
  0x49   :  { %1125 = dma.done.wait [#allocation9], 1536  }
  0x4a   :  { %1126 = vsyncadd [#allocation9], 4294965760 }
  0x4b   :  { %1127 = dma.done.wait [#allocation12], 2048  }
  0x4c   :  { %1128 = vsyncadd [#allocation12], 4294965248  ;;  %v120_v0 = vld [vmem:[#allocation2] sm:$0xff]  ;;  %v893_v3 = vld [vmem:[#allocation7 + $0x78] sm:$0xff]   ;;  %v1143_v23 = vmov 0.0   ;;  %vm1144_vm0 = vmmov 0  }
  0x4d   :  { %v121_v1 = vunpack.c.l.bf16 %v120_v0  ;;  %v122_v2 = vunpack.c.h.bf16 %v120_v0  ;;  %v894_v4 = vld [vmem:[#allocation7 + $0x38] sm:$0xff]   ;;  %810 = vmatprep.subr.bf16.mxu0 %v893_v3  ;;  %v895_v7 = vld [vmem:[#allocation7 + $0x70] sm:$0xff]   ;;  %v897_v10 = vld [vmem:[#allocation7 + $0x68] sm:$0xff]   ;;  %846 = vmatprep.subr.bf16.mxu1 %v1143_v23  ;;  %vm462_vm1 = vcmask 523264  }
  0x4e   :  { %811 = vmatpush3.bf16.msra.mxu0 %v894_v4  ;;  %v896_v8 = vld [vmem:[#allocation7 + $0x30] sm:$0xff]   ;;  %v898_v11 = vld [vmem:[#allocation7 + $0x28] sm:$0xff]   ;;  %v899_v12 = vld [vmem:[#allocation7 + $0x60] sm:$0xff]   ;;  %862 = vmatprep.mubr.msk.bf16.mxu1 %vm1144_vm0, %v1143_v23 }
  0x4f   :  { %v123_v5 = vmul.f32 %v121_v1, %v121_v1  ;;  %v124_v6 = vmul.f32 %v122_v2, %v122_v2  ;;  %812 = vmatprep.subr.bf16.mxu0 %v895_v7  ;;  %v900_v13 = vld [vmem:[#allocation7 + $0x20] sm:$0xff]   ;;  %v901_v14 = vld [vmem:[#allocation7 + $0x58] sm:$0xff]   ;;  %v903_v16 = vld [vmem:[#allocation7 + $0x50] sm:$0xff]  }
  0x50   :  { %v902_v15 = vld [vmem:[#allocation7 + $0x18] sm:$0xff]   ;;  %v904_v17 = vld [vmem:[#allocation7 + $0x10] sm:$0xff]   ;;  %v905_v18 = vld [vmem:[#allocation7 + $0x48] sm:$0xff]  }
  0x51   :  { %v125_v9 = vadd.f32 %v124_v6, %v123_v5  ;;  %v906_v19 = vld [vmem:[#allocation7 + $0x8] sm:$0xff]   ;;  %v907_v20 = vld [vmem:[#allocation7 + $0x40] sm:$0xff]   ;;  %v909_v22 = vld [vmem:[#allocation8 + $0x38] sm:$0xff]  }
  0x52   :  { %813 = vmatpush3.bf16.msra.mxu0 %v896_v8  ;;  %v908_v21 = vld [vmem:[#allocation7] sm:$0xff]   ;;  %847 = vmatpush3.bf16.msra.mxu1 %v909_v22  ;;  %v910_v24 = vld [vmem:[#allocation8 + $0x30] sm:$0xff]   ;;  %v911_v32 = vld [vmem:[#allocation8 + $0x28] sm:$0xff]  }
  0x53   :  { %126 = vadd.xlane.f32.xlu0 %v125_v9  ;;  %814 = vmatprep.subr.bf16.mxu0 %v897_v10  ;;  %v912_v33 = vld [vmem:[#allocation8 + $0x20] sm:$0xff]   ;;  %v913_v34 = vld [vmem:[#allocation8 + $0x18] sm:$0xff]   ;;  %v914_v35 = vld [vmem:[#allocation8 + $0x10] sm:$0xff]  }
  0x54   :  { %848 = vmatprep.subr.bf16.mxu1 %v1143_v23  ;;  %v915_v36 = vld [vmem:[#allocation8 + $0x8] sm:$0xff]   ;;  %v916_v37 = vld [vmem:[#allocation8] sm:$0xff]   ;;  %v917_v38 = vld [vmem:[#allocation10 + $0x18] sm:$0xff]  }
  0x55   :  { %v918_v39 = vld [vmem:[#allocation10 + $0x10] sm:$0xff]   ;;  %v919_v40 = vld [vmem:[#allocation10 + $0x8] sm:$0xff]   ;;  %v920_v50 = vld [vmem:[#allocation10] sm:$0xff]  }
  0x56   :  { %815 = vmatpush3.bf16.msra.mxu0 %v898_v11  ;;  %849 = vmatpush3.bf16.msra.mxu1 %v910_v24  ;;  %v760_v42 = vld [vmem:[%s1286_s3] ss:$0 sm:$0xff]  ;;  %v923_v52 = vld [vmem:[#allocation11 + $0x74] ss:$8 sps:$4 sm:$0xff]   ;;  %v926_v53 = vld [vmem:[#allocation11 + $0x64] ss:$8 sps:$4 sm:$0xff]   ;;  %v526_v24 = vlaneseq }
  0x57   :  { %816 = vmatprep.subr.bf16.mxu0 %v899_v12  ;;  %850 = vmatprep.subr.bf16.mxu1 %v1143_v23  ;;  %v921_v51 = vld [vmem:[#allocation11 + $0x70] ss:$8 sps:$4 sm:$0xff]   ;;  %v924_v54 = vld [vmem:[#allocation11 + $0x60] ss:$8 sps:$4 sm:$0xff]   ;;  %v929_v55 = vld [vmem:[#allocation11 + $0x54] ss:$8 sps:$4 sm:$0xff]  }
  0x58   :  { %v777_v56 = vld [vmem:[%s1288_s5] ss:$0 sm:$0xff]  ;;  %v932_v59 = vld [vmem:[#allocation11 + $0x44] ss:$8 sps:$4 sm:$0xff]   ;;  %v930_v0 = vld [vmem:[#allocation11 + $0x40] ss:$8 sps:$4 sm:$0xff]  }
  0x59   :  { %v927_v57 = vld [vmem:[#allocation11 + $0x50] ss:$8 sps:$4 sm:$0xff]   ;;  %v935_v3 = vld [vmem:[#allocation11 + $0x34] ss:$8 sps:$4 sm:$0xff]   ;;  %v938_v5 = vld [vmem:[#allocation11 + $0x24] ss:$8 sps:$4 sm:$0xff]  }
  0x5a   :  { %817 = vmatpush3.bf16.msra.mxu0 %v900_v13  ;;  %851 = vmatpush3.bf16.msra.mxu1 %v911_v32  ;;  %v933_v4 = vld [vmem:[#allocation11 + $0x30] ss:$8 sps:$4 sm:$0xff]   ;;  %v936_v6 = vld [vmem:[#allocation11 + $0x20] ss:$8 sps:$4 sm:$0xff]   ;;  %v941_v7 = vld [vmem:[#allocation11 + $0x14] ss:$8 sps:$4 sm:$0xff]  }
  0x5b   :  { %818 = vmatprep.subr.bf16.mxu0 %v901_v14  ;;  %852 = vmatprep.subr.bf16.mxu1 %v1143_v23  ;;  %v939_v8 = vld [vmem:[#allocation11 + $0x10] ss:$8 sps:$4 sm:$0xff]   ;;  %v944_v9 = vld [vmem:[#allocation11 + $0x4] ss:$8 sps:$4 sm:$0xff]   ;;  %v942_v10 = vld [vmem:[#allocation11] ss:$8 sps:$4 sm:$0xff]  }
  0x5c   :  { %v1145_v11 = vmov 0   ;;  %v786_v12 = vld [vmem:[%s1290_s7] ss:$0 sm:$0xff]  ;;  %s1146_s7 = smov [#allocation13]  }
  0x5e   :  { %819 = vmatpush3.bf16.msra.mxu0 %v902_v15  ;;  %853 = vmatpush3.bf16.msra.mxu1 %v912_v33 }
  0x5f   :  { %820 = vmatprep.subr.bf16.mxu0 %v903_v16  ;;  %854 = vmatprep.subr.bf16.mxu1 %v1143_v23 }
  0x62   :  { %821 = vmatpush3.bf16.msra.mxu0 %v904_v17  ;;  %855 = vmatpush3.bf16.msra.mxu1 %v913_v34 }
  0x63   :  { %822 = vmatprep.subr.bf16.mxu0 %v905_v18  ;;  %856 = vmatprep.subr.bf16.mxu1 %v1143_v23 }
  0x66   :  { %823 = vmatpush3.bf16.msra.mxu0 %v906_v19  ;;  %857 = vmatpush3.bf16.msra.mxu1 %v914_v35 }
  0x67   :  { %824 = vmatprep.subr.bf16.mxu0 %v907_v20  ;;  %858 = vmatprep.subr.bf16.mxu1 %v1143_v23  ;;  %v683_v20 = vld [vmem:[#allocation5] sm:$0xff] }
  0x68   :  { %v685_v22 = vunpack.c.h.bf16 %v683_v20 }
  0x6a   :  { %825 = vmatpush3.bf16.msra.mxu0 %v908_v21  ;;  %859 = vmatpush3.bf16.msra.mxu1 %v915_v36  ;;  %v684_v21 = vunpack.c.l.bf16 %v683_v20 }
  0x6b   :  { %866 = vmatprep.subr.bf16.mxu0 %v1143_v23  ;;  %860 = vmatprep.subr.bf16.mxu1 %v1143_v23 }
  0x6e   :  { %861 = vmatpush3.bf16.msra.mxu1 %v916_v37 }
  0x6f   :  { %616 = vmatprep.subr.bf16.mxu1 %v923_v52 }
  0xdc   :  { %v127_v25 = vpop.xlane.xlu0 %126 }
  0xdd   :  { %v128_v26 = vadd.f32 1e-24, %v127_v25  ;;  %v527_v25 = vshrl.u32 %v526_v24, 7 }
  0xdf   :  { %945 = vrsqrt.f32 %v128_v26  ;;  %v528_v26 = vsub.s32 0, %v527_v25 }
  0xec   :  { %v946_v27 = vpop.eup %945 }
  0xed   :  { %v131_v28 = vmul.f32 %v946_v27, %v122_v2  ;;  %v130_v29 = vmul.f32 %v946_v27, %v121_v1  ;;  %v524_v27 = vld [vmem:[%s1292_s9] sm:$0x3]  ;;  %s726_s9 = sshll.u32 %s1146_s7, 4  ;;  %s727_s9 = int_to_ptr.vmem [resolvable:$true] %s726_s9 }
  0xee   :  { %s1081_s25 = scalar_lea.vmem %s727_s9, 256  ;;  %p1086_p3 = scmp.lt.s32.totalorder %s727_s9, %s727_s9 }
  0xef   :  { %v133_v30 = vpack.c.bf16 %v131_v28, %v131_v28  ;;  %v132_v31 = vpack.c.bf16 %v130_v29, %v130_v29  ;;  %v532_v28 = vsub.s32 1, %v527_v25  ;;  %v529_v29 = vrot.slane %v524_v27, %v528_v26  ;;  %p1082_p2 = scmp.ne.s32.totalorder %s727_s9, %s1081_s25  ;;  %p1087_p4 = scmp.lt.s32.totalorder %s1081_s25, %s1081_s25 }
  0xf1   :  { %301 = vmatprep.mubr.bf16.mxu0 %v133_v30  ;;  %v533_v30 = vrot.slane %v524_v27, %v532_v28  ;;  %p1088_p5 = por %p1087_p4, %p1086_p3 }
  0xf2   :  { %302 = vmatmul.mubr.bf16.vlgmr.msra.gmra.mxu0 %v132_v31 }
  0xf3   :  { %874 = vmatprep.mubr.msk.bf16.mxu0 %vm1144_vm0, %v1143_v23  ;;  %867 = vmatpush3.bf16.msra.mxu0 %v917_v38  ;;  %p1089_p6 = pnand %p1088_p5, %p1082_p2 }
  0xf4   :  { %868 = vmatprep.subr.bf16.mxu0 %v1143_v23 }
  0xf7   :  { %869 = vmatpush3.bf16.msra.mxu0 %v918_v39 }
  0xf8   :  { %870 = vmatprep.subr.bf16.mxu0 %v1143_v23 }
  0xfb   :  { %871 = vmatpush3.bf16.msra.mxu0 %v919_v40 }
  0xfc   :  { %872 = vmatprep.subr.bf16.mxu0 %v1143_v23  ;;  %v694_v23 = vadd.f32 %v685_v22, %v684_v21 }
  0xff   :  { %873 = vmatpush3.bf16.msra.mxu0 %v920_v50 }
 0x1b2   :  { %v826_v41 = vpop.f32.mrf.mxu0 }
 0x1b4   :  { %v827_v43 = vpop.f32.mrf.mxu0 }
 0x1b5   :  { %v828_v44 = vadd.f32 %v827_v43, %v826_v41 }
 0x1b6   :  { %v829_v45 = vpop.f32.mrf.mxu0 }
 0x1b7   :  { %v304_v46 = vadd.f32 %v828_v44, %v760_v42 }
 0x1b8   :  { %v830_v47 = vpop.f32.mrf.mxu0 }
 0x1b9   :  { %947 = vtanh.f32 %v304_v46 }
 0x1c6   :  { %v948_v48 = vpop.eup %947 }
 0x1c7   :  { %v310_v49 = vpack.c.bf16 %v948_v48, %v948_v48 }
 0x1c9   :  { %863 = vmatmul.mubr.bf16.vlgmr.msra.gmra.mxu1 %v310_v49 }
 0x1ca   :  { %617 = vmatpush1.bf16.msra.mxu1 %v921_v51  ;;  %648 = vmatprep.mubr.bf16.mxu1 %v1145_v11 }
 0x1cb   :  { %618 = vmatprep.subr.bf16.mxu1 %v926_v53 }
 0x1ce   :  { %619 = vmatpush1.bf16.msra.mxu1 %v924_v54 }
 0x1cf   :  { %620 = vmatprep.subr.bf16.mxu1 %v929_v55 }
 0x1d2   :  { %621 = vmatpush1.bf16.msra.mxu1 %v927_v57 }
 0x1d3   :  { %622 = vmatprep.subr.bf16.mxu1 %v932_v59 }
 0x1d6   :  { %623 = vmatpush1.bf16.msra.mxu1 %v930_v0 }
 0x1d7   :  { %624 = vmatprep.subr.bf16.mxu1 %v935_v3 }
 0x1da   :  { %625 = vmatpush1.bf16.msra.mxu1 %v933_v4 }
 0x1db   :  { %626 = vmatprep.subr.bf16.mxu1 %v938_v5 }
 0x1de   :  { %627 = vmatpush1.bf16.msra.mxu1 %v936_v6 }
 0x1df   :  { %628 = vmatprep.subr.bf16.mxu1 %v941_v7 }
 0x1e2   :  { %629 = vmatpush1.bf16.msra.mxu1 %v939_v8 }
 0x1e3   :  { %630 = vmatprep.subr.bf16.mxu1 %v944_v9 }
 0x1e6   :  { %631 = vmatpush1.bf16.msra.mxu1 %v942_v10 }
 0x289   :  { %v416_v58 = vpop.f32.mrf.mxu1 }
 0x28a   :  { %v1251_v60 = vadd.f32 %v777_v56, %v416_v58 }
 0x28b   :  { %v864_v61 = vpop.f32.mrf.mxu1 }
 0x28c   :  { %v422_v62 = vpack.c.bf16 %v1251_v60, %v1251_v60  ;;  %v702_v63 = vmul.f32 %v1251_v60, %v1251_v60  ;;  %v708_v35 = vmul.f32 1.442695, %v1251_v60  ;;  %v701_v43 = vadd.f32 1.0, %v1251_v60 }
 0x28d   :  { %v419_v1 = vpop.f32.mrf.mxu1 }
 0x28e   :  { %704 = vrot.lane.b32.xlu0 %v702_v63, %s1136_s18  ;;  %875 = vmatmul.mubr.msk.bf16.vlgmr.msra.gmra.mxu0 %vm462_vm1, %v422_v62 }
 0x28f   :  { %v865_v2 = vpop.f32.mrf.mxu1 }
 0x2ad   :  { %695 = vadd.xlane.f32.xlu0 %v694_v23 }
 0x300   :  { %v705_v42 = vpop.permute.xlu0 %704 }
 0x301   :  { %v707_v44 = vsub.f32 %v701_v43, %v705_v42 }
 0x34e   :  { %v500_v13 = vpop.f32.mrf.mxu0 }
 0x34f   :  { %v501_v14 = vadd.f32 %v786_v12, %v500_v13 }
 0x350   :  { %v876_v15 = vpop.f32.mrf.mxu0 }
 0x351   :  { %949 = vtanh.f32 %v501_v14 }
 0x352   :  { %v503_v16 = vpop.f32.mrf.mxu0  ;;  %951 = vpow2.f32 %v708_v35 }
 0x354   :  { %v877_v17 = vpop.f32.mrf.mxu0 }
 0x35e   :  { %v950_v18 = vpop.eup %949 }
 0x35f   :  { %v507_v19 = vpack.c.bf16 %v950_v18, %v950_v18  ;;  %v952_v45 = vpop.eup %951 }
 0x360   :  { %v710_v46 = vsub.f32 %v707_v44, %v952_v45 }
 0x361   :  { %649 = vmatmul.mubr.bf16.vlgmr.msra.gmra.mxu1 %v507_v19 }
 0x421   :  { %v650_v31 = vpop.f32.mrf.mxu1 }
 0x422   :  { %v651_v32 = vadd.f32 %v650_v31, %v529_v29 }
 0x423   :  { %v652_v33 = vpop.f32.mrf.mxu1 }
 0x424   :  { %657 = vst [vmem:[#allocation13] sm:$0xff] %v651_v32  ;;  %v653_v34 = vadd.f32 %v652_v33, %v533_v30  ;;  %v689_v38 = vmul.f32 %v684_v21, %v651_v32 }
 0x425   :  { %v654_v36 = vpop.f32.mrf.mxu1 }
 0x426   :  { %658 = vst [vmem:[#allocation13 + $0x8] sm:$0xff] %v653_v34  ;;  %v659_v37 = vmax.f32 %v651_v32, %v653_v34  ;;  %v690_v39 = vmul.f32 %v685_v22, %v653_v34 }
 0x427   :  { %v655_v40 = vpop.f32.mrf.mxu1 }
 0x428   :  { %660 = vmax.xlane.f32.xlu1 %v659_v37  ;;  %v691_v41 = vadd.f32 %v690_v39, %v689_v38 }
 0x42a   :  { %692 = vadd.xlane.f32.xlu0 %v691_v41 }
 0x439   :  { %712 = vrot.lane.b32.xlu1 %v710_v46, %s1136_s18 }
 0x4b1   :  { %v661_v47 = vpop.xlane.xlu1 %660 }
 0x4b2   :  { %v662_v48 = vsub.f32 %v651_v32, %v661_v47  ;;  %v663_v49 = vsub.f32 %v653_v34, %v661_v47 }
 0x4b4   :  { %v664_v50 = vmul.f32 1.442695, %v662_v48  ;;  %v666_v51 = vmul.f32 1.442695, %v663_v49 }
 0x4b5   :  { %v713_v55 = vpop.permute.xlu1 %712 }
 0x4b6   :  { %953 = vpow2.f32 %v664_v50  ;;  %v715_v56 = vsel %vm462_vm1, %v713_v55, 0.0 }
 0x4b7   :  { %955 = vpow2.f32 %v666_v51 }
 0x4c3   :  { %v954_v52 = vpop.eup %953 }
 0x4c4   :  { %v956_v53 = vpop.eup %955 }
 0x4c5   :  { %v668_v54 = vadd.f32 %v956_v53, %v954_v52 }
 0x4c7   :  { %669 = vadd.xlane.f32.xlu1 %v668_v54 }
 0x4cb   :  { %716 = vadd.xlane.f32.xlu1 %v715_v56 }
 0x4cc   :  { %1092 = shalt.err (!%p1089_p6)
}
 0x4cd   :  { %729 = dma.vmem_to_hbm [thread:$0]  %s727_s9, 256, %s1293_s10, [#allocation4]   ;;  %vm699_vm2 = vcmask 7168   ;;  %v696_v62 = vpop.xlane.xlu0 %695 }
 0x4ce   :  { %s1147_s4 = smov [#allocation14]  }
 0x4cf   :  { %s736_s29 = sshll.u32 %s1147_s4, 4  ;;  %s737_s29 = int_to_ptr.vmem [resolvable:$true] %s736_s29 }
 0x4d0   :  { %s1101_s10 = scalar_lea.vmem %s737_s29, 128  ;;  %p1106_p8 = scmp.lt.s32.totalorder %s737_s29, %s737_s29 }
 0x4d1   :  { %p1102_p7 = scmp.ne.s32.totalorder %s737_s29, %s1101_s10  ;;  %p1107_p9 = scmp.lt.s32.totalorder %s1101_s10, %s1101_s10 }
 0x4d3   :  { %p1108_p10 = por %p1107_p9, %p1106_p8 }
 0x4d5   :  { %p1109_p11 = pnand %p1108_p10, %p1102_p7 }
 0x550   :  { %v670_v57 = vpop.xlane.xlu1 %669 }
 0x551   :  { %957 = vrcp.f32 %v670_v57 }
 0x552   :  { %959 = vlog2.f32 %v670_v57 }
 0x554   :  { %v717_v58 = vpop.xlane.xlu1 %716 }
 0x555   :  { %v718_v59 = vmul.f32 -0.5, %v717_v58 }
 0x557   :  { %719 = vst.msk [vmem:[%s1296_s13] sm:$0xff] %vm699_vm2, %v718_v59 }
 0x55e   :  { %v958_v60 = vpop.eup %957 }
 0x55f   :  { %v960_v61 = vpop.eup %959  ;;  %v672_v63 = vmul.f32 %v958_v60, %v954_v52  ;;  %v673_v0 = vmul.f32 %v958_v60, %v956_v53 }
 0x560   :  { %v687_v1 = vmul.f32 0.6931472, %v960_v61 }
 0x561   :  { %v809_v2 = vpack.c.bf16 %v673_v0, %v672_v63 }
 0x562   :  { %v688_v3 = vadd.f32 %v687_v1, %v661_v47 }
 0x563   :  { %682 = vst [vmem:[#allocation14] sm:$0xff] %v809_v2 }
 0x564   :  { %v697_v4 = vmul.f32 %v696_v62, %v688_v3 }
 0x565   :  { %1112 = shalt.err (!%p1109_p11)
}
 0x566   :  { %739 = dma.vmem_to_hbm [thread:$0]  %s737_s29, 128, %s1294_s11, [#allocation15]   ;;  %v693_v5 = vpop.xlane.xlu0 %692 }
 0x567   :  { %v698_v6 = vsub.f32 %v697_v4, %v693_v5 }
 0x569   :  { %700 = vst.msk [vmem:[%s1295_s12] sm:$0xff] %vm699_vm2, %v698_v6 }
 0x56a   :  { %1129 = dma.done.wait [#allocation4], 256  }
 0x56b   :  { %1130 = vsyncadd [#allocation4], 4294967040 }
 0x56c   :  { %1131 = dma.done.wait [#allocation15], 128  }
 0x56d   :  { %1132 = vsyncadd [#allocation15], 4294967168 }
 0x56e   :  { %754 = vsyncpa [#allocation3], 1 }
 0x56f   :  { %755 = vsyncpa [#allocation6], 1 }
 0x570   :  { %756 = vsyncpa [#allocation9], 1 }
 0x571   :  { %757 = vsyncpa [#allocation12], 1 }
 0x572   :  { %758 = vsyncpa [#allocation4], 1 }
 0x573   :  { %759 = vsyncpa [#allocation15], 1 }

</bundles_post_ra>
